<compile_context>
chip_gen: v7x
topology: tpu7x:2x2x1
jax: 0.10.0
libtpu: 0.0.40
codegen_flags: <defaults>
</compile_context>

<pallas_src>
import jax
import jax.numpy as jnp
from jax.experimental import pallas as pl
from jax.experimental.pallas import tpu as pltpu

LANE = 128      # TPU lane width; every feature dim is padded to this
SUBLANE = 8


def _round_up(x, m):
    return (x + m - 1) // m * m


def _pick_tile(n_pad, target):
    """Largest multiple of 128 that is <= target and divides n_pad."""
    t = min(target, n_pad)
    while n_pad % t:
        t -= LANE
    return t


def fused_gcn_kernel(a_ref, x_ref, w_ref, b_ref, o_ref, hw_ref, h_ref, acc_ref):
    """Grid = (layer, row_tile, k_tile).

    a_ref : (tm, tk)        A_hat tile (streamed, double-buffered)
    x_ref : (N_pad, 128)    padded input features (VMEM resident)
    w_ref : (3, 128, 128)   padded, stacked layer weights (VMEM resident)
    b_ref : (3, 1, 128)     padded, stacked biases, f32 (VMEM resident)
    o_ref : (tm, 128)       output tile (written only on the last layer)
    hw_ref: (N_pad, 128)    scratch: HW = H_{l-1} @ W_l for the current layer
    h_ref : (N_pad, 128)    scratch: H_l activations carried across layers
    acc_ref:(tm, 128) f32   scratch: aggregation accumulator
    """
    l = pl.program_id(0)
    r = pl.program_id(1)
    k = pl.program_id(2)
    n_layers = pl.num_programs(0)
    n_k = pl.num_programs(2)
    tm, tk = a_ref.shape

    # ---- once per layer (first row/k tile): feature transform HW = H_{l-1} @ W_l ----
    # (H@W first, A@(HW) second: O(N*F_in*F_out + N^2*F_out); never (A@H)@W.)
    @pl.when(jnp.logical_and(r == 0, k == 0))
    def _compute_hw():
        @pl.when(l == 0)
        def _():
            hw_ref[...] = jnp.dot(
                x_ref[...], w_ref[l], preferred_element_type=jnp.float32
            ).astype(hw_ref.dtype)

        @pl.when(l > 0)
        def _():
            hw_ref[...] = jnp.dot(
                h_ref[...], w_ref[l], preferred_element_type=jnp.float32
            ).astype(hw_ref.dtype)

    # ---- accumulator init at k == 0: fold the bias into the init (free bias add) ----
    @pl.when(k == 0)
    def _init_acc():
        acc_ref[...] = jnp.broadcast_to(b_ref[l], acc_ref.shape)

    # ---- neighbourhood aggregation: A_hat row-tile @ HW k-slab (MXU, f32 acc) ----
    k_start = pl.multiple_of(k * tk, tk)
    acc_ref[...] += jnp.dot(
        a_ref[...], hw_ref[pl.ds(k_start, tk), :],
        preferred_element_type=jnp.float32)

    # ---- epilogue at the last k tile ----
    @pl.when(k == n_k - 1)
    def _epilogue():
        is_last = l == n_layers - 1
        out = acc_ref[...]

        @pl.when(jnp.logical_not(is_last))
        def _():
            # hidden layer: ReLU in f32, keep activations resident in VMEM scratch
            r_start = pl.multiple_of(r * tm, tm)
            h_ref[pl.ds(r_start, tm), :] = jnp.maximum(out, 0.0).astype(h_ref.dtype)

        @pl.when(is_last)
        def _():
            # final layer: no ReLU, write the lane-dense output block
            o_ref[...] = out.astype(o_ref.dtype)


def gcn_forward(a_hat, x, params, *, compute_dtype=jnp.bfloat16,
                row_tile=256, k_tile=512):
    """GCN.forward: conv1 -> relu -> conv2 -> relu -> conv3, one fused Pallas kernel."""
    n, f_in = x.shape
    num_classes = params[-1][0].shape[1]
    n_layers = len(params)

    n_pad = _round_up(max(n, SUBLANE), LANE)
    f_pad = LANE  # all feature dims (16/32/16/8) fit one 128-lane slab

    # zero-pad + cast once on the host side (padding is mathematically inert:
    # padded rows/cols of A_hat, X, W, b are zero)
    a_p = jnp.zeros((n_pad, n_pad), compute_dtype).at[:n, :n].set(
        a_hat.astype(compute_dtype))
    x_p = jnp.zeros((n_pad, f_pad), compute_dtype).at[:n, :f_in].set(
        x.astype(compute_dtype))
    w_stack = jnp.zeros((n_layers, f_pad, f_pad), compute_dtype)
    b_stack = jnp.zeros((n_layers, 1, f_pad), jnp.float32)
    for i, (w, b) in enumerate(params):
        w_stack = w_stack.at[i, :w.shape[0], :w.shape[1]].set(w.astype(compute_dtype))
        b_stack = b_stack.at[i, :, :b.shape[1]].set(b.astype(jnp.float32))

    tm = _pick_tile(n_pad, row_tile)
    tk = _pick_tile(n_pad, k_tile)
    grid = (n_layers, n_pad // tm, n_pad // tk)

    vmem_resident = pl.BlockSpec(memory_space=pltpu.MemorySpace.VMEM)

    out = pl.pallas_call(
        fused_gcn_kernel,
        out_shape=jax.ShapeDtypeStruct((n_pad, f_pad), jnp.float32),
        grid_spec=pltpu.PrefetchScalarGridSpec(
            num_scalar_prefetch=0,
            grid=grid,
            in_specs=[
                pl.BlockSpec((tm, tk), lambda l, r, k: (r, k)),  # A_hat tiles
                vmem_resident,   # x        (N_pad, 128)
                vmem_resident,   # weights  (3, 128, 128)
                vmem_resident,   # biases   (3, 1, 128)
            ],
            out_specs=pl.BlockSpec((tm, f_pad), lambda l, r, k: (r, 0)),
            scratch_shapes=[
                pltpu.VMEM((n_pad, f_pad), compute_dtype),  # HW = H_{l-1} @ W_l
                pltpu.VMEM((n_pad, f_pad), compute_dtype),  # H_l (carried across layers)
                pltpu.VMEM((tm, f_pad), jnp.float32),       # f32 accumulator
            ],
        ),
        compiler_params=pltpu.CompilerParams(
            # "arbitrary" everywhere: the layer axis is sequential, and row tiles
            # write a shared per-core VMEM scratch read by the *next* layer, so
            # megacore row-sharding would be incorrect here.
            dimension_semantics=("arbitrary", "arbitrary", "arbitrary"),
            # well under v7x's 64 MiB physical VMEM (and v5e/v6e's 128 MiB)
            vmem_limit_bytes=32 * 1024 * 1024,
        ),
    )(a_p, x_p, w_stack, b_stack)

    return out[:n, :num_classes]


def gcn_reference(a_hat, x, params):
    """Pure-JAX f32 reference for correctness checking."""
    (w1, b1), (w2, b2), (w3, b3) = params
    h = jnp.maximum(a_hat @ (x @ w1) + b1, 0.0)
    h = jnp.maximum(a_hat @ (h @ w2) + b2, 0.0)
    return a_hat @ (h @ w3) + b3


def xavier_uniform(key, fan_in, fan_out):
    limit = jnp.sqrt(6.0 / (fan_in + fan_out))
    return jax.random.uniform(
        key, (fan_in, fan_out), dtype=jnp.float32, minval=-limit, maxval=limit)


if __name__ == "__main__":
    # Small synthetic problem consistent with GCN(in_feats, h_feats, num_classes).
    N = 300            # nodes (pads to 384 -> exercises multi-tile grid)
    IN_FEATS = 16
    H_FEATS = 32
    NUM_CLASSES = 8

    key = jax.random.PRNGKey(0)
    k_adj, k_x, k_w1, k_w2, k_w3, k_b1, k_b2, k_b3 = jax.random.split(key, 8)

    # Deterministic random undirected graph + self loops, symmetric normalization.
    adj = (jax.random.uniform(k_adj, (N, N), dtype=jnp.float32) < 0.05).astype(jnp.float32)
    adj = jnp.maximum(adj, adj.T)
    adj = jnp.maximum(adj, jnp.eye(N, dtype=jnp.float32))
    d_inv_sqrt = 1.0 / jnp.sqrt(jnp.sum(adj, axis=1))
    a_hat = d_inv_sqrt[:, None] * adj * d_inv_sqrt[None, :]

    x = jax.random.normal(k_x, (N, IN_FEATS), dtype=jnp.float32)

    # Non-zero biases so the bias-folding path is genuinely exercised.
    params = (
        (xavier_uniform(k_w1, IN_FEATS, H_FEATS),
         0.1 * jax.random.normal(k_b1, (1, H_FEATS), dtype=jnp.float32)),
        (xavier_uniform(k_w2, H_FEATS, H_FEATS // 2),
         0.1 * jax.random.normal(k_b2, (1, H_FEATS // 2), dtype=jnp.float32)),
        (xavier_uniform(k_w3, H_FEATS // 2, NUM_CLASSES),
         0.1 * jax.random.normal(k_b3, (1, NUM_CLASSES), dtype=jnp.float32)),
    )

    ref = gcn_reference(a_hat, x, params)

    # f32 path with small tiles: exercises multi-row / multi-k accumulation + layer carry.
    out_f32 = jax.block_until_ready(
        gcn_forward(a_hat, x, params, compute_dtype=jnp.float32,
                    row_tile=128, k_tile=128))
    assert out_f32.shape == (N, NUM_CLASSES)
    assert jnp.allclose(out_f32, ref, atol=2e-2, rtol=2e-2)

    # bf16 path (recommended on v6e/v7x): f32 accumulation, looser tolerance.
    out_bf16 = jax.block_until_ready(
        gcn_forward(a_hat, x, params, compute_dtype=jnp.bfloat16))
    assert out_bf16.shape == (N, NUM_CLASSES)
    assert jnp.allclose(out_bf16, ref, atol=5e-2, rtol=5e-2)

    print("KERNEL_OK")
</pallas_src>

<mosaic_0001>
module attributes {stable_mosaic.version = 11 : i64} {
  func.func @fused_gcn_kernel(%arg0: i32, %arg1: i32, %arg2: i32, %arg3: memref<128x128xf32, #tpu.memory_space<vmem>>, %arg4: memref<384x128xf32, #tpu.memory_space<vmem>>, %arg5: memref<3x128x128xf32, #tpu.memory_space<vmem>>, %arg6: memref<3x1x128xf32, #tpu.memory_space<vmem>>, %arg7: memref<128x128xf32, #tpu.memory_space<vmem>>, %arg8: memref<384x128xf32, #tpu.memory_space<vmem>>, %arg9: memref<384x128xf32, #tpu.memory_space<vmem>>, %arg10: memref<128x128xf32, #tpu.memory_space<vmem>>) attributes {dimension_semantics = [#tpu.dimension_semantics<arbitrary>, #tpu.dimension_semantics<arbitrary>, #tpu.dimension_semantics<arbitrary>], iteration_bounds = array<i64: 3, 3, 3>, scalar_prefetch = 0 : i64, scratch_operands = 3 : i64, tpu.core_type = #tpu.core_type<tc>, window_params = [{transform_indices = @transform_0, window_bounds = array<i64: 128, 128>}, {pipeline_mode = #tpu.pipeline_mode<synchronous>, transform_indices = @transform_1, window_bounds = array<i64: 384, 128>}, {pipeline_mode = #tpu.pipeline_mode<synchronous>, transform_indices = @transform_2, window_bounds = array<i64: 3, 128, 128>}, {pipeline_mode = #tpu.pipeline_mode<synchronous>, transform_indices = @transform_3, window_bounds = array<i64: 3, 1, 128>}, {transform_indices = @transform_4, window_bounds = array<i64: 128, 128>}]} {
    %c0_i32 = arith.constant 0 : i32
    %0 = arith.cmpi eq, %arg1, %c0_i32 : i32
    %c0_i32_0 = arith.constant 0 : i32
    %1 = arith.cmpi eq, %arg2, %c0_i32_0 : i32
    %2 = arith.andi %0, %1 : i1
    %3 = arith.extui %2 : i1 to i32
    %c0_i32_1 = arith.constant 0 : i32
    %4 = arith.cmpi ne, %3, %c0_i32_1 : i32
    scf.if %4 {
      %c0_i32_11 = arith.constant 0 : i32
      %20 = arith.cmpi eq, %arg0, %c0_i32_11 : i32
      %21 = arith.extui %20 : i1 to i32
      %c0_i32_12 = arith.constant 0 : i32
      %22 = arith.cmpi ne, %21, %c0_i32_12 : i32
      scf.if %22 {
        %c0_15 = arith.constant 0 : index
        %c0_16 = arith.constant 0 : index
        %26 = vector.load %arg4[%c0_15, %c0_16] : memref<384x128xf32, #tpu.memory_space<vmem>>, vector<384x128xf32>
        %27 = arith.index_cast %arg0 : i32 to index
        %c0_17 = arith.constant 0 : index
        %c0_18 = arith.constant 0 : index
        %28 = vector.load %arg5[%27, %c0_17, %c0_18] : memref<3x128x128xf32, #tpu.memory_space<vmem>>, vector<1x128x128xf32>
        %29 = vector.shape_cast %28 : vector<1x128x128xf32> to vector<128x128xf32>
        %cst_19 = arith.constant dense<0.000000e+00> : vector<384x128xf32>
        %30 = tpu.matmul %26, %29, %cst_19 {dimension_numbers = #tpu.dot_dimension_numbers<[1], [0], [0], [1], [0, 0, 1, 1], [], []>} : vector<384x128xf32>, vector<128x128xf32>, vector<384x128xf32> -> vector<384x128xf32>
        %c0_20 = arith.constant 0 : index
        %c0_21 = arith.constant 0 : index
        %31 = vector.load %arg8[%c0_20, %c0_21] : memref<384x128xf32, #tpu.memory_space<vmem>>, vector<384x128xf32>
        tpu.vector_store %arg8[%c0_20, %c0_21], %30 {strides = array<i32>} : memref<384x128xf32, #tpu.memory_space<vmem>>, vector<384x128xf32>,
      } else {
      }
      %c0_i32_13 = arith.constant 0 : i32
      %23 = arith.cmpi sgt, %arg0, %c0_i32_13 : i32
      %24 = arith.extui %23 : i1 to i32
      %c0_i32_14 = arith.constant 0 : i32
      %25 = arith.cmpi ne, %24, %c0_i32_14 : i32
      scf.if %25 {
        %c0_15 = arith.constant 0 : index
        %c0_16 = arith.constant 0 : index
        %26 = vector.load %arg9[%c0_15, %c0_16] : memref<384x128xf32, #tpu.memory_space<vmem>>, vector<384x128xf32>
        %27 = arith.index_cast %arg0 : i32 to index
        %c0_17 = arith.constant 0 : index
        %c0_18 = arith.constant 0 : index
        %28 = vector.load %arg5[%27, %c0_17, %c0_18] : memref<3x128x128xf32, #tpu.memory_space<vmem>>, vector<1x128x128xf32>
        %29 = vector.shape_cast %28 : vector<1x128x128xf32> to vector<128x128xf32>
        %cst_19 = arith.constant dense<0.000000e+00> : vector<384x128xf32>
        %30 = tpu.matmul %26, %29, %cst_19 {dimension_numbers = #tpu.dot_dimension_numbers<[1], [0], [0], [1], [0, 0, 1, 1], [], []>} : vector<384x128xf32>, vector<128x128xf32>, vector<384x128xf32> -> vector<384x128xf32>
        %c0_20 = arith.constant 0 : index
        %c0_21 = arith.constant 0 : index
        %31 = vector.load %arg8[%c0_20, %c0_21] : memref<384x128xf32, #tpu.memory_space<vmem>>, vector<384x128xf32>
        tpu.vector_store %arg8[%c0_20, %c0_21], %30 {strides = array<i32>} : memref<384x128xf32, #tpu.memory_space<vmem>>, vector<384x128xf32>,
      } else {
      }
    } else {
    }
    %c0_i32_2 = arith.constant 0 : i32
    %5 = arith.cmpi eq, %arg2, %c0_i32_2 : i32
    %6 = arith.extui %5 : i1 to i32
    %c0_i32_3 = arith.constant 0 : i32
    %7 = arith.cmpi ne, %6, %c0_i32_3 : i32
    scf.if %7 {
      %20 = arith.index_cast %arg0 : i32 to index
      %c0_11 = arith.constant 0 : index
      %c0_12 = arith.constant 0 : index
      %21 = vector.load %arg6[%20, %c0_11, %c0_12] : memref<3x1x128xf32, #tpu.memory_space<vmem>>, vector<1x1x128xf32>
      %22 = vector.shape_cast %21 : vector<1x1x128xf32> to vector<1x128xf32>
      %23 = vector.shape_cast %22 : vector<1x128xf32> to vector<1x128xf32>
      %24 = vector.broadcast %23 : vector<1x128xf32> to vector<128x128xf32>
      %c0_13 = arith.constant 0 : index
      %c0_14 = arith.constant 0 : index
      %25 = vector.load %arg10[%c0_13, %c0_14] : memref<128x128xf32, #tpu.memory_space<vmem>>, vector<128x128xf32>
      tpu.vector_store %arg10[%c0_13, %c0_14], %24 {strides = array<i32>} : memref<128x128xf32, #tpu.memory_space<vmem>>, vector<128x128xf32>,
    } else {
    }
    %c128_i32 = arith.constant 128 : i32
    %8 = arith.muli %arg2, %c128_i32 : i32
    %9 = tpu.assume_multiple %8, 128 : i32
    %c0 = arith.constant 0 : index
    %c0_4 = arith.constant 0 : index
    %10 = vector.load %arg10[%c0, %c0_4] : memref<128x128xf32, #tpu.memory_space<vmem>>, vector<128x128xf32>
    %c0_5 = arith.constant 0 : index
    %c0_6 = arith.constant 0 : index
    %11 = vector.load %arg3[%c0_5, %c0_6] : memref<128x128xf32, #tpu.memory_space<vmem>>, vector<128x128xf32>
    %12 = arith.index_cast %9 : i32 to index
    %c0_7 = arith.constant 0 : index
    %13 = vector.load %arg8[%12, %c0_7] : memref<384x128xf32, #tpu.memory_space<vmem>>, vector<128x128xf32>
    %cst = arith.constant dense<0.000000e+00> : vector<128x128xf32>
    %14 = tpu.matmul %11, %13, %cst {dimension_numbers = #tpu.dot_dimension_numbers<[1], [0], [0], [1], [0, 0, 1, 1], [], []>} : vector<128x128xf32>, vector<128x128xf32>, vector<128x128xf32> -> vector<128x128xf32>
    %15 = arith.addf %10, %14 : vector<128x128xf32>
    %c0_8 = arith.constant 0 : index
    %c0_9 = arith.constant 0 : index
    %16 = vector.load %arg10[%c0_8, %c0_9] : memref<128x128xf32, #tpu.memory_space<vmem>>, vector<128x128xf32>
    tpu.vector_store %arg10[%c0_8, %c0_9], %15 {strides = array<i32>} : memref<128x128xf32, #tpu.memory_space<vmem>>, vector<128x128xf32>,
    %c2_i32 = arith.constant 2 : i32
    %17 = arith.cmpi eq, %arg2, %c2_i32 : i32
    %18 = arith.extui %17 : i1 to i32
    %c0_i32_10 = arith.constant 0 : i32
    %19 = arith.cmpi ne, %18, %c0_i32_10 : i32
    scf.if %19 {
      %c2_i32_11 = arith.constant 2 : i32
      %20 = arith.cmpi eq, %arg0, %c2_i32_11 : i32
      %c0_12 = arith.constant 0 : index
      %c0_13 = arith.constant 0 : index
      %21 = vector.load %arg10[%c0_12, %c0_13] : memref<128x128xf32, #tpu.memory_space<vmem>>, vector<128x128xf32>
      %true = arith.constant true
      %22 = arith.xori %20, %true : i1
      %23 = arith.extui %22 : i1 to i32
      %c0_i32_14 = arith.constant 0 : i32
      %24 = arith.cmpi ne, %23, %c0_i32_14 : i32
      scf.if %24 {
        %c128_i32_16 = arith.constant 128 : i32
        %27 = arith.muli %arg1, %c128_i32_16 : i32
        %28 = tpu.assume_multiple %27, 128 : i32
        %cst_17 = arith.constant 0.000000e+00 : f32
        %29 = vector.broadcast %cst_17 : f32 to vector<128x128xf32>
        %30 = arith.maximumf %21, %29 : vector<128x128xf32>
        %31 = arith.index_cast %28 : i32 to index
        %c0_18 = arith.constant 0 : index
        %32 = vector.load %arg9[%31, %c0_18] : memref<384x128xf32, #tpu.memory_space<vmem>>, vector<128x128xf32>
        tpu.vector_store %arg9[%31, %c0_18], %30 {strides = array<i32>} : memref<384x128xf32, #tpu.memory_space<vmem>>, vector<128x128xf32>,
      } else {
      }
      %25 = arith.extui %20 : i1 to i32
      %c0_i32_15 = arith.constant 0 : i32
      %26 = arith.cmpi ne, %25, %c0_i32_15 : i32
      scf.if %26 {
        %c0_16 = arith.constant 0 : index
        %c0_17 = arith.constant 0 : index
        %27 = vector.load %arg7[%c0_16, %c0_17] : memref<128x128xf32, #tpu.memory_space<vmem>>, vector<128x128xf32>
        tpu.vector_store %arg7[%c0_16, %c0_17], %21 {strides = array<i32>} : memref<128x128xf32, #tpu.memory_space<vmem>>, vector<128x128xf32>,
      } else {
      }
    } else {
    }
    return
  }
  func.func @transform_0(%arg0: i32, %arg1: i32, %arg2: i32) -> (i32, i32) {
    %c0_i32 = arith.constant 0 : i32
    return %arg1, %arg2 : i32, i32
  }
  func.func @transform_1(%arg0: i32, %arg1: i32, %arg2: i32) -> (i32, i32) {
    %c0_i32 = arith.constant 0 : i32
    %c0_i32_0 = arith.constant 0 : i32
    %c0_i32_1 = arith.constant 0 : i32
    return %c0_i32, %c0_i32_0 : i32, i32
  }
  func.func @transform_2(%arg0: i32, %arg1: i32, %arg2: i32) -> (i32, i32, i32) {
    %c0_i32 = arith.constant 0 : i32
    %c0_i32_0 = arith.constant 0 : i32
    %c0_i32_1 = arith.constant 0 : i32
    %c0_i32_2 = arith.constant 0 : i32
    return %c0_i32, %c0_i32_0, %c0_i32_1 : i32, i32, i32
  }
  func.func @transform_3(%arg0: i32, %arg1: i32, %arg2: i32) -> (i32, i32, i32) {
    %c0_i32 = arith.constant 0 : i32
    %c0_i32_0 = arith.constant 0 : i32
    %c0_i32_1 = arith.constant 0 : i32
    %c0_i32_2 = arith.constant 0 : i32
    return %c0_i32, %c0_i32_0, %c0_i32_1 : i32, i32, i32
  }
  func.func @transform_4(%arg0: i32, %arg1: i32, %arg2: i32) -> (i32, i32) {
    %c0_i32 = arith.constant 0 : i32
    %c0_i32_0 = arith.constant 0 : i32
    return %arg1, %c0_i32 : i32, i32
  }
}

</mosaic_0001>

<bundles_post_ra>
// kernel: tpu_custom_call.1
= control target key start
LH: loop header
LB: loop body
LE: loop exit
PB: predicated region body
PF: predicated region fallthrough
CT: control target
= control target key end

     0   :  { %s3046_s0 = inlined_call_operand.hbm [shape: f32[384,384], index: 0, kind: input, shape index: {}]   ;;  %s3047_s1 = inlined_call_operand.hbm [shape: f32[384,128], index: 1, kind: input, shape index: {}]   ;;  %s3048_s2 = inlined_call_operand.hbm [shape: f32[3,128,128], index: 2, kind: input, shape index: {}]   ;;  %s3049_s3 = inlined_call_operand.vmem [shape: f32[3,1,128], index: 3, kind: input, shape index: {}]   ;;  %s3050_s4 = inlined_call_operand.hbm [shape: f32[384,128], index: 4, kind: output, shape index: {}]  }
   0x1   :  { %3066 = sst [smem:[#allocation21_spill]] %s3047_s1 }
   0x2   :  { %3067 = sst [smem:[#allocation22_spill]] %s3048_s2 }
   0x3   :  { %3068 = sst [smem:[#allocation23_spill]] %s3049_s3 }
   0x4   :  { %3069 = sst [smem:[#allocation24_spill]] %s3050_s4 }
   0x5   :  { %9 = vsyncpa [#allocation6], 0 }
   0x6   :  { %11 = vsyncpa [#allocation6 + $0x1], 0 }
   0x7   :  { %12 = vsyncpa [#allocation9], 0 }
   0x8   :  { %13 = vsyncpa [#allocation7], 0 }
   0x9   :  { %15 = vsyncpa [#allocation7 + $0x1], 0  ;;  %s2597_s15 = smov 0   ;;  %s2599_s16 = smov 0  }
   0xa   :  { %s2601_s17 = smov 0   ;;  %s2603_s18 = smov 0  }
   0xb   :  { %s2605_s19 = smov 0   ;;  %s2607_s20 = smov 0  }
   0xc   :  { %s2609_s21 = smov 0   ;;  %s2611_s22 = smov 0  }
   0xd   :  { %s2613_s23 = smov 0   ;;  %s2615_s24 = smov 0  }
   0xe   :  { %s2617_s25 = smov 0   ;;  %s2619_s26 = smov 0  }
   0xf   :  { %s2621_s27 = smov 0  }
  0x10 LB: > { %3070 = sst [smem:[#allocation15_spill]] %s2513_s15  ;;  %s1588_s28 = sadd.s32 4294967295, %s2561_s27   ;;  %s2561_s27 = sphi %s2621_s27, %s3116_s27   ;;  %s2557_s26 = sphi %s2619_s26, %s3115_s26   ;;  %s2553_s25 = sphi %s2617_s25, %s3114_s25   ;;  %s2549_s24 = sphi %s2615_s24, %s3113_s24   ;;  %s2545_s23 = sphi %s2613_s23, %s3112_s23   ;;  %s2541_s22 = sphi %s2611_s22, %s3111_s22   ;;  %s2537_s21 = sphi %s2609_s21, %s3110_s21   ;;  %s2533_s20 = sphi %s2607_s20, %s3109_s20   ;;  %s2529_s19 = sphi %s2605_s19, %s3108_s19   ;;  %s2525_s18 = sphi %s2603_s18, %s3107_s18   ;;  %s2521_s17 = sphi %s2601_s17, %s3106_s17   ;;  %s2517_s16 = sphi %s2599_s16, %s3105_s16   ;;  %s2513_s15 = sphi %s2597_s15, %s3104_s15  }
  0x11   : > { %3071 = sst [smem:[#allocation16_spill]] %s2561_s27  ;;  %s1589_s29 = sadd.s32 4294967294, %s2561_s27  }
  0x12   : > { %p56_p0 = scmp.ne.s32.totalorder %s2533_s20, %s2529_s19  ;;  %p57_p1 = scmp.eq.s32.totalorder %s2561_s27, 0 }
  0x13   : > { %p62_p2 = scmp.ne.s32.totalorder %s2529_s19, %s2525_s18  ;;  %p2667_p3 = scmp.eq.s32.totalorder %s1588_s28, 0 }
  0x14   : > { %p2672_p4 = por %p57_p1, %p56_p0  ;;  %p148_p5 = scmp.ne.s32.totalorder %s2521_s17, %s2517_s16 }
  0x15   : > { %s3072_s5 = scalar_select %p2667_p3, 1, 0 }
  0x16   : > { %p2680_p6 = por %p2667_p3, %p62_p2  ;;  %p149_p7 = scmp.eq.s32.totalorder %s1588_s28, 26 }
  0x17   : > { %p154_p8 = scmp.ne.s32.totalorder %s2517_s16, %s2513_s15  ;;  %p155_p9 = scmp.eq.s32.totalorder %s1589_s29, 26 }
  0x18   : > { %s3074_s8 = scalar_select %p2680_p6, 1, 0 }
  0x19   : > { %p2686_p10 = por %p149_p7, %p148_p5  ;;  %p1590_p11 = scmp.ge.s32.totalorder %s2561_s27, 1 }
  0x1a   : > { %p2691_p12 = por %p155_p9, %p154_p8  ;;  %p162_p13 = scmp.lt.s32.totalorder %s2561_s27, 28 }
  0x1b   : > { %s3075_s9 = scalar_select %p2686_p10, 1, 0 }
  0x1c   : > { %s3077_s10 = scalar_select %p2691_p12, 1, 0 }
  0x1d   : > { %3076 = sst [smem:[#allocation17_spill]] %s3075_s9  ;;  %p2696_p0 = pnand %p1590_p11, %p162_p13 }
  0x1e   : > { %3078 = sst [smem:[#allocation18_spill]] %s3077_s10  ;;  %s2563_s12 = smov [#allocation8]  }
  0x1f   : > { %s174_s13 = sshll.u32 %s2563_s12, 4  ;;  %p2201_p1 = pneg %p2696_p0  ;;  %s2700_s13 = int_to_ptr.vmem [resolvable:$true] %s174_s13 }
  0x20   : > { %p2218_p2 = scmp.lt.s32.totalorder %s2561_s27, 27  ;;  %s2564_s28 = smov [#allocation10]  }
  0x21   : > { %p2707_p5 = pnand %p2201_p1, %p2667_p3  ;;  %s187_s29 = sshll.u32 %s2564_s28, 4  ;;  %s2717_s29 = int_to_ptr.vmem [resolvable:$true] %s187_s29 }
  0x22   : > { %p2713_p7 = pnand %p2218_p2, %p2672_p4  ;;  %s3082_s1 = sld [smem:[#allocation21_spill]] }
  0x23   : > { %p2335_p9 = pneg %p2707_p5 }
  0x28   : > { %s2333_s30 = scalar_lea.hbm %s3082_s1, 6144 }
  0x29   : > { %p2334_p8 = scmp.ne.s32.totalorder %s3082_s1, %s2333_s30  ;;  %p2340_p13 = scmp.lt.u32.totalorder %s2333_s30, %s3082_s1 }
  0x2b   : > { %p2336_p4 = pnand %p2335_p9, %p2334_p8 }
  0x2d   : > { %p2337_p11 = pneg %p2336_p4 }
  0x2f   : > { %p2342_p1 = pnand %p2340_p13, %p2337_p11 }
  0x31   : > { %2345 = shalt.err (!%p2342_p1)
}
  0x32   : > { %s2346_s6 = scalar_lea.vmem %s2700_s13, 6144  ;;  %p2354_p3 = scmp.lt.s32.totalorder %s2700_s13, %s2700_s13 }
  0x33   : > { %p2347_p2 = scmp.ne.s32.totalorder %s2700_s13, %s2346_s6  ;;  %p2355_p8 = scmp.lt.s32.totalorder %s2346_s6, %s2346_s6 }
  0x35   : > { %p2349_p12 = pnand %p2347_p2, %p2335_p9  ;;  %p2356_p4 = por %p2355_p8, %p2354_p3 }
  0x37   : > { %p2350_p10 = pneg %p2349_p12 }
  0x39   : > { %p2357_p6 = pnand %p2356_p4, %p2350_p10 }
  0x3b   : > { %2360 = shalt.err (!%p2357_p6)
}
  0x3c   : > { %s3062_s15 = smov 128   ;;  %s3063_s27 = smov 8  }
  0x3d   : > { %2204 = dma.hbm_to_vmem [thread:$0]  (!%p2707_p5), %s3082_s1, 6144, %s2700_s13, [#allocation9], %s3062_s15, %s3062_s15, %s3063_s27  }
  0x3e   : > { %s3083_s2 = sld [smem:[#allocation22_spill]] }
  0x44   : > { %s2361_s7 = scalar_lea.hbm %s3083_s2, 6144 }
  0x45   : > { %p2362_p3 = scmp.ne.s32.totalorder %s3083_s2, %s2361_s7  ;;  %p2368_p12 = scmp.lt.u32.totalorder %s2361_s7, %s3083_s2 }
  0x47   : > { %p2364_p6 = pnand %p2362_p3, %p2335_p9 }
  0x49   : > { %p2365_p10 = pneg %p2364_p6 }
  0x4b   : > { %p2370_p11 = pnand %p2368_p12, %p2365_p10 }
  0x4d   : > { %2373 = shalt.err (!%p2370_p11)
}
  0x4e   : > { %s2374_s13 = scalar_lea.vmem %s2717_s29, 6144  ;;  %p2382_p8 = scmp.lt.s32.totalorder %s2717_s29, %s2717_s29 }
  0x4f   : > { %p2375_p13 = scmp.ne.s32.totalorder %s2717_s29, %s2374_s13  ;;  %p2383_p4 = scmp.lt.s32.totalorder %s2374_s13, %s2374_s13 }
  0x51   : > { %p2377_p1 = pnand %p2375_p13, %p2335_p9  ;;  %p2384_p3 = por %p2383_p4, %p2382_p8 }
  0x53   : > { %p2378_p2 = pneg %p2377_p1 }
  0x55   : > { %p2385_p6 = pnand %p2384_p3, %p2378_p2 }
  0x57   : > { %2388 = shalt.err (!%p2385_p6)
}
  0x58   : > { %2207 = dma.hbm_to_vmem [thread:$0]  (!%p2707_p5), %s3083_s2, 6144, %s2717_s29, [#allocation9], %s3062_s15, %s3062_s15, %s3063_s27  }
  0x59   : > { %s36_s9 = sadd.s32 1, %s2553_s25  ;;  %s33_s14 = sadd.s32 1, %s2549_s24 }
  0x5a   : > { %s40_s30 = sadd.s32 1, %s2557_s26  ;;  %p34_p9 = scmp.ge.s32.totalorder %s33_s14, 3 }
  0x5b   : > { %s204_s10 = sand.u32 1, %s2533_s20   ;;  %s2188_s7 = smul.u32 48, %s2553_s25 }
  0x5c   : > { %s1594_s28 = sshll.u32 %s204_s10, 7  ;;  %s3118_s14 = smov (%p34_p9, %s33_s14), 0 }
  0x5d   : > { %3084 = sst [smem:[#allocation19_spill]] %s3118_s14  ;;  %s3120_s9 = smov (!%p34_p9, %s36_s9), %s2553_s25 }
  0x5e   : > { %s45_s12 = ssub.s32 %s2549_s24, %s3118_s14  ;;  %p38_p10 = scmp.ge.s32.totalorder %s3120_s9, 3 }
  0x5f   : > { %s208_s29 = scalar_lea.vmem [#allocation5], %s1594_s28  ;;  %s214_s3 = sadd.s32 %s2549_s24, %s2188_s7 }
  0x60   : > { %s217_s6 = sshll.u32 %s208_s29, 4  ;;  %s3122_s9 = smov (%p38_p10, %s3120_s9), 0  ;;  %s2805_s6 = int_to_ptr.vmem [resolvable:$true] %s217_s6 }
  0x61   : > { %3085 = sst [smem:[#allocation20_spill]] %s3122_s9  ;;  %s3124_s30 = smov (!%p38_p10, %s40_s30), %s2557_s26 }
  0x62   : > { %s44_s13 = ssub.s32 %s2553_s25, %s3122_s9  ;;  %p42_p5 = scmp.ge.s32.totalorder %s3124_s30, 3 }
  0x63   : > { %s46_s4 = sor.u32 %s45_s12, %s44_s13  ;;  %p136_p11 = scmp.eq.s32.totalorder %s44_s13, 0 }
  0x64   : > { %p47_p12 = scmp.eq.s32.totalorder %s46_s4, 0  ;;  %s3126_s30 = smov (%p42_p5, %s3124_s30), 0 }
  0x65   : > { %s3086_s15 = sadd.s32 1, %s2533_s20  ;;  %s3087_s1 = sadd.s32 1, %s2521_s17 }
  0x66   : > { %s2798_s27 = scalar_select %p47_p12, %s2533_s20, %s3086_s15  }
  0x67   : > { %s2803_s28 = scalar_select %p136_p11, %s2521_s17, %s3087_s1  }
  0x68   : > { %s1597_s29 = sshll.u32 %s214_s3, 7  ;;  %s2812_s12 = scalar_lea.sflag [#allocation6], %s204_s10 }
  0x69   : > { %s2810_s9 = scalar_lea.hbm %s3046_s0, %s1597_s29  ;;  %p2391_p1 = pneg %p2713_p7 }
  0x6a   : > { %s2389_s7 = scalar_lea.hbm %s2810_s9, 2048  ;;  %s2394_s2 = scalar_lea.hbm %s3046_s0, 18432 }
  0x6b   : > { %p2390_p13 = scmp.ne.s32.totalorder %s2810_s9, %s2389_s7  ;;  %p2395_p4 = scmp.lt.u32.totalorder %s2810_s9, %s3046_s0 }
  0x6c   : > { %p2396_p3 = scmp.lt.u32.totalorder %s2394_s2, %s2389_s7  ;;  %p2398_p9 = scmp.lt.u32.totalorder %s2389_s7, %s2810_s9 }
  0x6d   : > { %p2392_p2 = pnand %p2391_p1, %p2390_p13 }
  0x6e   : > { %p2397_p6 = por %p2396_p3, %p2395_p4 }
  0x6f   : > { %p2393_p8 = pneg %p2392_p2 }
  0x70   : > { %p2399_p10 = por %p2398_p9, %p2397_p6 }
  0x72   : > { %p2400_p5 = pnand %p2399_p10, %p2393_p8 }
  0x74   : > { %2403 = shalt.err (!%p2400_p5)
}
  0x75   : > { %s2404_s10 = scalar_lea.vmem %s2805_s6, 2048  ;;  %s2567_s3 = smov [#allocation5]  }
  0x76   : > { %p2405_p12 = scmp.ne.s32.totalorder %s2805_s6, %s2404_s10  ;;  %s2409_s4 = sshll.u32 %s2567_s3, 4  ;;  %s2410_s4 = int_to_ptr.vmem [resolvable:$false] %s2409_s4 }
  0x77   : > { %s2411_s29 = scalar_lea.vmem %s2410_s4, 4096  ;;  %p2412_p2 = scmp.lt.s32.totalorder %s2805_s6, %s2410_s4 }
  0x78   : > { %p2407_p11 = pnand %p2405_p12, %p2391_p1  ;;  %p2413_p4 = scmp.lt.s32.totalorder %s2411_s29, %s2404_s10 }
  0x7a   : > { %p2408_p13 = pneg %p2407_p11  ;;  %p2414_p3 = por %p2413_p4, %p2412_p2 }
  0x7c   : > { %p2415_p6 = pnand %p2414_p3, %p2408_p13 }
  0x7e   : > { %2418 = shalt.err (!%p2415_p6)
}
  0x7f   : > { %s2568_s7 = smov 384   ;;  %s3088_s1 = smov 8  }
  0x80   : > { %s3089_s15 = smov 128   ;;  %229 = sbr.rel (%p2696_p0) target bundleno = 1072 (0x430), region = 36 }
  0x81   : > { %2211 = dma.hbm_to_vmem [thread:$0]  (!%p2713_p7), %s2810_s9, 2048, %s2805_s6, %s2812_s12, %s2568_s7, %s3089_s15, %s3088_s1  }
  0x82   : > { %s231_s2 = sand.u32 (!%p2696_p0), 1, %s2529_s19   ;;  %p3090_p1 = scmp.ne.s32.totalorder (!%p2696_p0), %s3074_s8, 0 }
  0x83   : > { %s1599_s14 = sshll.u32 (!%p2696_p0), %s231_s2, 7  ;;  %s232_s13 = scalar_lea.sflag (!%p2696_p0), [#allocation6], %s231_s2 }
  0x84   : > { %s2845_s10 = scalar_lea.vmem (!%p2696_p0), [#allocation5], %s1599_s14 }
  0x87   : > { %2500 = dma.done.wait (%p3090_p1), %s232_s13, 2048  }
  0x88   : > { %2502 = vsyncadd (%p3090_p1), %s232_s13, 4294965248  ;;  %p3091_p8 = scmp.ne.s32.totalorder %s3072_s5, 0 }
  0x8a   : > { %2504 = dma.done.wait (%p3091_p8), [#allocation9], 12288  }
  0x8b   : > { %2506 = vsyncadd (%p3091_p8), [#allocation9], 4294955008  ;;  %s265_s11 = sand.u32 1, %s2517_s16   ;;  %p270_p0 = scmp.eq.s32.totalorder %s2541_s22, 0 }
  0x8c   : > { %s1602_s18 = sshll.u32 %s265_s11, 7  ;;  %p271_p7 = scmp.eq.s32.totalorder %s2537_s21, 0 }
  0x8d   : > { %s2860_s9 = scalar_lea.vmem [#allocation11], %s1602_s18 }
  0x8e   : > { %p272_p9 = pnand %p271_p7, %p270_p0 }
  0x8f   : > { %p1603_p10 = scmp.ne.s32.totalorder (!%p272_p9), %s2545_s23, 0 }
  0x90   : > { %275 = sbr.rel (%p272_p9) target bundleno = 742 (0x2e6), region = 52 }
  0x97   : > { %279 = sbr.rel (%p1603_p10) target bundleno = 446 (0x1be), region = 56  ;;  %s1604_s8 = sshll.u32 (!%p1603_p10), %s2545_s23, 7  ;;  %v280_v0 = vld [vmem:[#allocation8] sm:$0xff] (!%p1603_p10)  ;;  %v281_v26 = vld [vmem:[#allocation8 + $0x8] sm:$0xff] (!%p1603_p10)  ;;  %v282_v28 = vld [vmem:[#allocation8 + $0x10] sm:$0xff] (!%p1603_p10) }
  0x98   : > { %v304_v1 = vld [vmem:[#allocation8 + $0xc0] sm:$0xff] (!%p1603_p10)  ;;  %1812 = vmatprep.mubr.f32.mxu0 (!%p1603_p10), %v280_v0  ;;  %s2864_s5 = scalar_lea.vmem (!%p1603_p10), [#allocation10], %s1604_s8  ;;  %v305_v27 = vld [vmem:[#allocation8 + $0xc8] sm:$0xff] (!%p1603_p10)  ;;  %v306_v29 = vld [vmem:[#allocation8 + $0xd0] sm:$0xff] (!%p1603_p10) }
  0x99   : > { %1848 = vmatprep.mubr.f32.mxu1 (!%p1603_p10), %v304_v1  ;;  %v330_v2 = vld [vmem:[%s2864_s5] sm:$0xff] (!%p1603_p10)  ;;  %v331_v3 = vld [vmem:[%s2864_s5 + $0x8] sm:$0xff] (!%p1603_p10)  ;;  %v332_v4 = vld [vmem:[%s2864_s5 + $0x10] sm:$0xff] (!%p1603_p10) }
  0x9a   : > { %v2044_v5 = vpack.c.bf16 (!%p1603_p10), %v331_v3, %v330_v2  ;;  %v333_v6 = vld [vmem:[%s2864_s5 + $0x18] sm:$0xff] (!%p1603_p10)  ;;  %v334_v8 = vld [vmem:[%s2864_s5 + $0x20] sm:$0xff] (!%p1603_p10)  ;;  %v335_v9 = vld [vmem:[%s2864_s5 + $0x28] sm:$0xff] (!%p1603_p10) }
  0x9b   : > { %v2048_v7 = vpack.c.bf16 (!%p1603_p10), %v333_v6, %v332_v4  ;;  %v2052_v10 = vpack.c.bf16 (!%p1603_p10), %v335_v9, %v334_v8  ;;  %v336_v11 = vld [vmem:[%s2864_s5 + $0x30] sm:$0xff] (!%p1603_p10)  ;;  %v337_v12 = vld [vmem:[%s2864_s5 + $0x38] sm:$0xff] (!%p1603_p10)  ;;  %v338_v14 = vld [vmem:[%s2864_s5 + $0x40] sm:$0xff] (!%p1603_p10) }
  0x9c   : > { %2045 = vmatprep.subr.bf16.mxu0 (!%p1603_p10), %v2044_v5  ;;  %2140 = vmatprep.subr.bf16.mxu1 (!%p1603_p10), %v2044_v5  ;;  %v2056_v13 = vpack.c.bf16 (!%p1603_p10), %v337_v12, %v336_v11  ;;  %v339_v15 = vld [vmem:[%s2864_s5 + $0x48] sm:$0xff] (!%p1603_p10)  ;;  %v340_v17 = vld [vmem:[%s2864_s5 + $0x50] sm:$0xff] (!%p1603_p10)  ;;  %v341_v18 = vld [vmem:[%s2864_s5 + $0x58] sm:$0xff] (!%p1603_p10) }
  0x9d   : > { %2047 = vmatpush3.bf16.msra.mxu0 (!%p1603_p10), %v2044_v5  ;;  %2148 = vmatpush3.bf16.msra.mxu1 (!%p1603_p10), %v2044_v5  ;;  %v2060_v16 = vpack.c.bf16 (!%p1603_p10), %v339_v15, %v338_v14  ;;  %v2064_v19 = vpack.c.bf16 (!%p1603_p10), %v341_v18, %v340_v17  ;;  %v342_v20 = vld [vmem:[%s2864_s5 + $0x60] sm:$0xff] (!%p1603_p10)  ;;  %v343_v21 = vld [vmem:[%s2864_s5 + $0x68] sm:$0xff] (!%p1603_p10)  ;;  %v344_v23 = vld [vmem:[%s2864_s5 + $0x70] sm:$0xff] (!%p1603_p10) }
  0x9e   : > { %2049 = vmatprep.subr.bf16.mxu0 %v2048_v7  ;;  %2141 = vmatprep.subr.bf16.mxu1 %v2048_v7  ;;  %v2068_v22 = vpack.c.bf16 %v343_v21, %v342_v20  ;;  %v345_v24 = vld [vmem:[%s2864_s5 + $0x78] sm:$0xff]  ;;  %v284_v32 = vld [vmem:[#allocation8 + $0x20] sm:$0xff]  ;;  %v285_v34 = vld [vmem:[#allocation8 + $0x28] sm:$0xff] }
  0x9f   : > { %v2072_v25 = vpack.c.bf16 %v345_v24, %v344_v23  ;;  %v283_v30 = vld [vmem:[#allocation8 + $0x18] sm:$0xff]  ;;  %v308_v33 = vld [vmem:[#allocation8 + $0xe0] sm:$0xff]  ;;  %v309_v35 = vld [vmem:[#allocation8 + $0xe8] sm:$0xff] }
  0xa0   : > { %v307_v31 = vld [vmem:[#allocation8 + $0xd8] sm:$0xff]  ;;  %v286_v36 = vld [vmem:[#allocation8 + $0x30] sm:$0xff]  ;;  %v288_v40 = vld [vmem:[#allocation8 + $0x40] sm:$0xff] }
  0xa1   : > { %2051 = vmatpush3.bf16.msra.mxu0 %v2048_v7  ;;  %2149 = vmatpush3.bf16.msra.mxu1 %v2048_v7  ;;  %v310_v37 = vld [vmem:[#allocation8 + $0xf0] sm:$0xff]  ;;  %v287_v38 = vld [vmem:[#allocation8 + $0x38] sm:$0xff]  ;;  %v312_v41 = vld [vmem:[#allocation8 + $0x100] sm:$0xff] }
  0xa2   : > { %2053 = vmatprep.subr.bf16.mxu0 %v2052_v10  ;;  %2142 = vmatprep.subr.bf16.mxu1 %v2052_v10  ;;  %v311_v39 = vld [vmem:[#allocation8 + $0xf8] sm:$0xff]  ;;  %v289_v42 = vld [vmem:[#allocation8 + $0x48] sm:$0xff]  ;;  %v290_v44 = vld [vmem:[#allocation8 + $0x50] sm:$0xff] }
  0xa3   : > { %v313_v43 = vld [vmem:[#allocation8 + $0x108] sm:$0xff]  ;;  %v314_v45 = vld [vmem:[#allocation8 + $0x110] sm:$0xff]  ;;  %v291_v46 = vld [vmem:[#allocation8 + $0x58] sm:$0xff] }
  0xa4   : > { %v315_v47 = vld [vmem:[#allocation8 + $0x118] sm:$0xff]  ;;  %v292_v48 = vld [vmem:[#allocation8 + $0x60] sm:$0xff]  ;;  %v293_v50 = vld [vmem:[#allocation8 + $0x68] sm:$0xff] }
  0xa5   : > { %2055 = vmatpush3.bf16.msra.mxu0 %v2052_v10  ;;  %2150 = vmatpush3.bf16.msra.mxu1 %v2052_v10  ;;  %v316_v49 = vld [vmem:[#allocation8 + $0x120] sm:$0xff]  ;;  %v317_v51 = vld [vmem:[#allocation8 + $0x128] sm:$0xff]  ;;  %v294_v52 = vld [vmem:[#allocation8 + $0x70] sm:$0xff] }
  0xa6   : > { %2057 = vmatprep.subr.bf16.mxu0 %v2056_v13  ;;  %2143 = vmatprep.subr.bf16.mxu1 %v2056_v13  ;;  %v318_v53 = vld [vmem:[#allocation8 + $0x130] sm:$0xff]  ;;  %v295_v54 = vld [vmem:[#allocation8 + $0x78] sm:$0xff]  ;;  %v296_v56 = vld [vmem:[#allocation8 + $0x80] sm:$0xff] }
  0xa7   : > { %v319_v55 = vld [vmem:[#allocation8 + $0x138] sm:$0xff]  ;;  %v320_v57 = vld [vmem:[#allocation8 + $0x140] sm:$0xff]  ;;  %v297_v58 = vld [vmem:[#allocation8 + $0x88] sm:$0xff] }
  0xa8   : > { %v321_v59 = vld [vmem:[#allocation8 + $0x148] sm:$0xff]  ;;  %v298_v60 = vld [vmem:[#allocation8 + $0x90] sm:$0xff]  ;;  %v299_v62 = vld [vmem:[#allocation8 + $0x98] sm:$0xff] }
  0xa9   : > { %2059 = vmatpush3.bf16.msra.mxu0 %v2056_v13  ;;  %2151 = vmatpush3.bf16.msra.mxu1 %v2056_v13  ;;  %v322_v61 = vld [vmem:[#allocation8 + $0x150] sm:$0xff]  ;;  %v323_v63 = vld [vmem:[#allocation8 + $0x158] sm:$0xff]  ;;  %v300_v0 = vld [vmem:[#allocation8 + $0xa0] sm:$0xff] }
  0xaa   : > { %2061 = vmatprep.subr.bf16.mxu0 %v2060_v16  ;;  %2144 = vmatprep.subr.bf16.mxu1 %v2060_v16  ;;  %v324_v1 = vld [vmem:[#allocation8 + $0x160] sm:$0xff]  ;;  %v301_v2 = vld [vmem:[#allocation8 + $0xa8] sm:$0xff]  ;;  %v302_v4 = vld [vmem:[#allocation8 + $0xb0] sm:$0xff] }
  0xab   : > { %v325_v3 = vld [vmem:[#allocation8 + $0x168] sm:$0xff]  ;;  %v326_v5 = vld [vmem:[#allocation8 + $0x170] sm:$0xff]  ;;  %v303_v6 = vld [vmem:[#allocation8 + $0xb8] sm:$0xff] }
  0xac   : > { %v327_v7 = vld [vmem:[#allocation8 + $0x178] sm:$0xff] }
  0xad   : > { %2063 = vmatpush3.bf16.msra.mxu0 %v2060_v16  ;;  %2152 = vmatpush3.bf16.msra.mxu1 %v2060_v16 }
  0xae   : > { %2065 = vmatprep.subr.bf16.mxu0 %v2064_v19  ;;  %2145 = vmatprep.subr.bf16.mxu1 %v2064_v19 }
  0xb1   : > { %2067 = vmatpush3.bf16.msra.mxu0 %v2064_v19  ;;  %2153 = vmatpush3.bf16.msra.mxu1 %v2064_v19 }
  0xb2   : > { %2069 = vmatprep.subr.bf16.mxu0 %v2068_v22  ;;  %2146 = vmatprep.subr.bf16.mxu1 %v2068_v22 }
  0xb5   : > { %2071 = vmatpush3.bf16.msra.mxu0 %v2068_v22  ;;  %2154 = vmatpush3.bf16.msra.mxu1 %v2068_v22 }
  0xb6   : > { %2073 = vmatprep.subr.bf16.mxu0 %v2072_v25  ;;  %2147 = vmatprep.subr.bf16.mxu1 %v2072_v25 }
  0xb9   : > { %2075 = vmatpush3.bf16.msra.mxu0 %v2072_v25  ;;  %2155 = vmatpush3.bf16.msra.mxu1 %v2072_v25 }
  0xbc   : > { %1813 = vmatmul.mubr.f32.vlgmr.msra.gmra.mrb[0].mxu0 %v281_v26  ;;  %1849 = vmatmul.mubr.f32.vlgmr.msra.gmra.mrb[0].mxu1 %v305_v27 }
  0xbd   : > { %1815 = vmatprep.mubr.f32.mxu0 %v282_v28  ;;  %1851 = vmatprep.mubr.f32.mxu1 %v306_v29 }
  0xc0   : > { %1816 = vmatmul.mubr.f32.gmra.mrb[2].mxu0 %v283_v30  ;;  %1852 = vmatmul.mubr.f32.gmra.mrb[2].mxu1 %v307_v31 }
  0xc1   : > { %1818 = vmatprep.mubr.f32.mxu0 %v284_v32  ;;  %1854 = vmatprep.mubr.f32.mxu1 %v308_v33 }
  0xc4   : > { %1819 = vmatmul.mubr.f32.gmra.mrb[4].mxu0 %v285_v34  ;;  %1855 = vmatmul.mubr.f32.gmra.mrb[4].mxu1 %v309_v35 }
  0xc5   : > { %1821 = vmatprep.mubr.f32.mxu0 %v286_v36  ;;  %1857 = vmatprep.mubr.f32.mxu1 %v310_v37 }
  0xc8   : > { %1822 = vmatmul.mubr.f32.gmra.mrb[6].mxu0 %v287_v38  ;;  %1858 = vmatmul.mubr.f32.gmra.mrb[6].mxu1 %v311_v39 }
  0xc9   : > { %1824 = vmatprep.mubr.f32.mxu0 %v288_v40  ;;  %1860 = vmatprep.mubr.f32.mxu1 %v312_v41 }
  0xcc   : > { %1825 = vmatmul.mubr.f32.gmra.mrb[8].mxu0 %v289_v42  ;;  %1861 = vmatmul.mubr.f32.gmra.mrb[8].mxu1 %v313_v43 }
  0xcd   : > { %1827 = vmatprep.mubr.f32.mxu0 %v290_v44  ;;  %1863 = vmatprep.mubr.f32.mxu1 %v314_v45 }
  0xd0   : > { %1828 = vmatmul.mubr.f32.gmra.mrb[10].mxu0 %v291_v46  ;;  %1864 = vmatmul.mubr.f32.gmra.mrb[10].mxu1 %v315_v47 }
  0xd1   : > { %1830 = vmatprep.mubr.f32.mxu0 %v292_v48  ;;  %1866 = vmatprep.mubr.f32.mxu1 %v316_v49 }
  0xd4   : > { %1831 = vmatmul.mubr.f32.gmra.mrb[12].mxu0 %v293_v50  ;;  %1867 = vmatmul.mubr.f32.gmra.mrb[12].mxu1 %v317_v51 }
  0xd5   : > { %1833 = vmatprep.mubr.f32.mxu0 %v294_v52  ;;  %1869 = vmatprep.mubr.f32.mxu1 %v318_v53 }
  0xd8   : > { %1834 = vmatmul.mubr.f32.gmra.mrb[14].mxu0 %v295_v54  ;;  %1870 = vmatmul.mubr.f32.gmra.mrb[14].mxu1 %v319_v55 }
  0xd9   : > { %1836 = vmatprep.mubr.f32.mxu0 %v296_v56  ;;  %1872 = vmatprep.mubr.f32.mxu1 %v320_v57 }
  0xdc   : > { %1837 = vmatmul.mubr.f32.gmra.mrb[16].mxu0 %v297_v58  ;;  %1873 = vmatmul.mubr.f32.gmra.mrb[16].mxu1 %v321_v59 }
  0xdd   : > { %1839 = vmatprep.mubr.f32.mxu0 %v298_v60  ;;  %1875 = vmatprep.mubr.f32.mxu1 %v322_v61 }
  0xe0   : > { %1840 = vmatmul.mubr.f32.gmra.mrb[18].mxu0 %v299_v62  ;;  %1876 = vmatmul.mubr.f32.gmra.mrb[18].mxu1 %v323_v63 }
  0xe1   : > { %1842 = vmatprep.mubr.f32.mxu0 %v300_v0  ;;  %1878 = vmatprep.mubr.f32.mxu1 %v324_v1 }
  0xe4   : > { %1843 = vmatmul.mubr.f32.gmra.mrb[20].mxu0 %v301_v2  ;;  %1879 = vmatmul.mubr.f32.gmra.mrb[20].mxu1 %v325_v3 }
  0xe5   : > { %1845 = vmatprep.mubr.f32.mxu0 %v302_v4  ;;  %1881 = vmatprep.mubr.f32.mxu1 %v326_v5 }
  0xe8   : > { %1846 = vmatmul.mubr.f32.gmra.mrb[22].mxu0 %v303_v6  ;;  %1882 = vmatmul.mubr.f32.gmra.mrb[22].mxu1 %v327_v7 }
 0x18f   : > { %v1814_v8 = vpop.f32.mrb[0].mxu0  ;;  %v1850_v9 = vpop.f32.mrb[0].mxu1 }
 0x190   : > { %652 = vst [vmem:[#allocation2 + $0x8] sm:$0xff] %v1814_v8  ;;  %676 = vst [vmem:[#allocation2 + $0xc8] sm:$0xff] %v1850_v9  ;;  %v412_v10 = vpop.f32.mrb[1].mxu0  ;;  %v532_v11 = vpop.f32.mrb[1].mxu1 }
 0x191   : > { %651 = vst [vmem:[#allocation2] sm:$0xff] %v412_v10  ;;  %675 = vst [vmem:[#allocation2 + $0xc0] sm:$0xff] %v532_v11 }
 0x193   : > { %v1817_v12 = vpop.f32.mrb[2].mxu0  ;;  %v1853_v13 = vpop.f32.mrb[2].mxu1 }
 0x194   : > { %654 = vst [vmem:[#allocation2 + $0x18] sm:$0xff] %v1817_v12  ;;  %678 = vst [vmem:[#allocation2 + $0xd8] sm:$0xff] %v1853_v13  ;;  %v422_v14 = vpop.f32.mrb[3].mxu0  ;;  %v542_v15 = vpop.f32.mrb[3].mxu1 }
 0x195   : > { %653 = vst [vmem:[#allocation2 + $0x10] sm:$0xff] %v422_v14  ;;  %677 = vst [vmem:[#allocation2 + $0xd0] sm:$0xff] %v542_v15 }
 0x197   : > { %v1820_v16 = vpop.f32.mrb[4].mxu0  ;;  %v1856_v17 = vpop.f32.mrb[4].mxu1 }
 0x198   : > { %656 = vst [vmem:[#allocation2 + $0x28] sm:$0xff] %v1820_v16  ;;  %680 = vst [vmem:[#allocation2 + $0xe8] sm:$0xff] %v1856_v17  ;;  %v432_v18 = vpop.f32.mrb[5].mxu0  ;;  %v552_v19 = vpop.f32.mrb[5].mxu1 }
 0x199   : > { %655 = vst [vmem:[#allocation2 + $0x20] sm:$0xff] %v432_v18  ;;  %679 = vst [vmem:[#allocation2 + $0xe0] sm:$0xff] %v552_v19 }
 0x19b   : > { %v1823_v20 = vpop.f32.mrb[6].mxu0  ;;  %v1859_v21 = vpop.f32.mrb[6].mxu1 }
 0x19c   : > { %658 = vst [vmem:[#allocation2 + $0x38] sm:$0xff] %v1823_v20  ;;  %682 = vst [vmem:[#allocation2 + $0xf8] sm:$0xff] %v1859_v21  ;;  %v442_v22 = vpop.f32.mrb[7].mxu0  ;;  %v562_v23 = vpop.f32.mrb[7].mxu1 }
 0x19d   : > { %657 = vst [vmem:[#allocation2 + $0x30] sm:$0xff] %v442_v22  ;;  %681 = vst [vmem:[#allocation2 + $0xf0] sm:$0xff] %v562_v23 }
 0x19f   : > { %v1826_v24 = vpop.f32.mrb[8].mxu0  ;;  %v1862_v25 = vpop.f32.mrb[8].mxu1 }
 0x1a0   : > { %660 = vst [vmem:[#allocation2 + $0x48] sm:$0xff] %v1826_v24  ;;  %684 = vst [vmem:[#allocation2 + $0x108] sm:$0xff] %v1862_v25  ;;  %v452_v26 = vpop.f32.mrb[9].mxu0  ;;  %v572_v27 = vpop.f32.mrb[9].mxu1 }
 0x1a1   : > { %659 = vst [vmem:[#allocation2 + $0x40] sm:$0xff] %v452_v26  ;;  %683 = vst [vmem:[#allocation2 + $0x100] sm:$0xff] %v572_v27 }
 0x1a3   : > { %v1829_v28 = vpop.f32.mrb[10].mxu0  ;;  %v1865_v29 = vpop.f32.mrb[10].mxu1 }
 0x1a4   : > { %662 = vst [vmem:[#allocation2 + $0x58] sm:$0xff] %v1829_v28  ;;  %686 = vst [vmem:[#allocation2 + $0x118] sm:$0xff] %v1865_v29  ;;  %v462_v30 = vpop.f32.mrb[11].mxu0  ;;  %v582_v31 = vpop.f32.mrb[11].mxu1 }
 0x1a5   : > { %661 = vst [vmem:[#allocation2 + $0x50] sm:$0xff] %v462_v30  ;;  %685 = vst [vmem:[#allocation2 + $0x110] sm:$0xff] %v582_v31 }
 0x1a7   : > { %v1832_v32 = vpop.f32.mrb[12].mxu0  ;;  %v1868_v33 = vpop.f32.mrb[12].mxu1 }
 0x1a8   : > { %664 = vst [vmem:[#allocation2 + $0x68] sm:$0xff] %v1832_v32  ;;  %688 = vst [vmem:[#allocation2 + $0x128] sm:$0xff] %v1868_v33  ;;  %v472_v34 = vpop.f32.mrb[13].mxu0  ;;  %v592_v35 = vpop.f32.mrb[13].mxu1 }
 0x1a9   : > { %663 = vst [vmem:[#allocation2 + $0x60] sm:$0xff] %v472_v34  ;;  %687 = vst [vmem:[#allocation2 + $0x120] sm:$0xff] %v592_v35 }
 0x1ab   : > { %v1835_v36 = vpop.f32.mrb[14].mxu0  ;;  %v1871_v37 = vpop.f32.mrb[14].mxu1 }
 0x1ac   : > { %666 = vst [vmem:[#allocation2 + $0x78] sm:$0xff] %v1835_v36  ;;  %690 = vst [vmem:[#allocation2 + $0x138] sm:$0xff] %v1871_v37  ;;  %v482_v38 = vpop.f32.mrb[15].mxu0  ;;  %v602_v39 = vpop.f32.mrb[15].mxu1 }
 0x1ad   : > { %665 = vst [vmem:[#allocation2 + $0x70] sm:$0xff] %v482_v38  ;;  %689 = vst [vmem:[#allocation2 + $0x130] sm:$0xff] %v602_v39 }
 0x1af   : > { %v1838_v40 = vpop.f32.mrb[16].mxu0  ;;  %v1874_v41 = vpop.f32.mrb[16].mxu1 }
 0x1b0   : > { %668 = vst [vmem:[#allocation2 + $0x88] sm:$0xff] %v1838_v40  ;;  %692 = vst [vmem:[#allocation2 + $0x148] sm:$0xff] %v1874_v41  ;;  %v492_v42 = vpop.f32.mrb[17].mxu0  ;;  %v612_v43 = vpop.f32.mrb[17].mxu1 }
 0x1b1   : > { %667 = vst [vmem:[#allocation2 + $0x80] sm:$0xff] %v492_v42  ;;  %691 = vst [vmem:[#allocation2 + $0x140] sm:$0xff] %v612_v43 }
 0x1b3   : > { %v1841_v44 = vpop.f32.mrb[18].mxu0  ;;  %v1877_v45 = vpop.f32.mrb[18].mxu1 }
 0x1b4   : > { %670 = vst [vmem:[#allocation2 + $0x98] sm:$0xff] %v1841_v44  ;;  %694 = vst [vmem:[#allocation2 + $0x158] sm:$0xff] %v1877_v45  ;;  %v502_v46 = vpop.f32.mrb[19].mxu0  ;;  %v622_v47 = vpop.f32.mrb[19].mxu1 }
 0x1b5   : > { %669 = vst [vmem:[#allocation2 + $0x90] sm:$0xff] %v502_v46  ;;  %693 = vst [vmem:[#allocation2 + $0x150] sm:$0xff] %v622_v47 }
 0x1b7   : > { %v1844_v48 = vpop.f32.mrb[20].mxu0  ;;  %v1880_v49 = vpop.f32.mrb[20].mxu1 }
 0x1b8   : > { %672 = vst [vmem:[#allocation2 + $0xa8] sm:$0xff] %v1844_v48  ;;  %696 = vst [vmem:[#allocation2 + $0x168] sm:$0xff] %v1880_v49  ;;  %v512_v50 = vpop.f32.mrb[21].mxu0  ;;  %v632_v51 = vpop.f32.mrb[21].mxu1 }
 0x1b9   : > { %671 = vst [vmem:[#allocation2 + $0xa0] sm:$0xff] %v512_v50  ;;  %695 = vst [vmem:[#allocation2 + $0x160] sm:$0xff] %v632_v51 }
 0x1bb   : > { %v1847_v52 = vpop.f32.mrb[22].mxu0  ;;  %v1883_v53 = vpop.f32.mrb[22].mxu1 }
 0x1bc   : > { %674 = vst [vmem:[#allocation2 + $0xb8] sm:$0xff] %v1847_v52  ;;  %698 = vst [vmem:[#allocation2 + $0x178] sm:$0xff] %v1883_v53  ;;  %v522_v54 = vpop.f32.mrb[23].mxu0  ;;  %v642_v55 = vpop.f32.mrb[23].mxu1 }
 0x1bd   : > { %673 = vst [vmem:[#allocation2 + $0xb0] sm:$0xff] %v522_v54  ;;  %697 = vst [vmem:[#allocation2 + $0x170] sm:$0xff] %v642_v55 }
 0x1be PF: > { %p1605_p5 = scmp.le.s32.totalorder %s2545_s23, 0 }
 0x1bf   : > { %s1606_s6 = sshll.u32 (!%p1605_p5), %s2545_s23, 7  ;;  %v703_v56 = vld [vmem:[#allocation3] sm:$0xff] (!%p1605_p5)  ;;  %v704_v18 = vld [vmem:[#allocation3 + $0x8] sm:$0xff] (!%p1605_p5)  ;;  %v705_v20 = vld [vmem:[#allocation3 + $0x10] sm:$0xff] (!%p1605_p5) }
 0x1c0   : > { %702 = sbr.rel (%p1605_p5) target bundleno = 742 (0x2e6), region = 60  ;;  %v727_v57 = vld [vmem:[#allocation3 + $0xc0] sm:$0xff] (!%p1605_p5)  ;;  %1916 = vmatprep.mubr.f32.mxu0 (!%p1605_p5), %v703_v56  ;;  %s2884_s12 = scalar_lea.vmem (!%p1605_p5), [#allocation10], %s1606_s6  ;;  %v728_v19 = vld [vmem:[#allocation3 + $0xc8] sm:$0xff] (!%p1605_p5)  ;;  %v729_v21 = vld [vmem:[#allocation3 + $0xd0] sm:$0xff] (!%p1605_p5) }
 0x1c1   : > { %1952 = vmatprep.mubr.f32.mxu1 (!%p1605_p5), %v727_v57  ;;  %v753_v58 = vld [vmem:[%s2884_s12] sm:$0xff] (!%p1605_p5)  ;;  %v754_v59 = vld [vmem:[%s2884_s12 + $0x8] sm:$0xff] (!%p1605_p5)  ;;  %v755_v60 = vld [vmem:[%s2884_s12 + $0x10] sm:$0xff] (!%p1605_p5) }
 0x1c2   : > { %v2076_v61 = vpack.c.bf16 (!%p1605_p5), %v754_v59, %v753_v58  ;;  %v756_v62 = vld [vmem:[%s2884_s12 + $0x18] sm:$0xff] (!%p1605_p5)  ;;  %v757_v0 = vld [vmem:[%s2884_s12 + $0x20] sm:$0xff] (!%p1605_p5)  ;;  %v758_v1 = vld [vmem:[%s2884_s12 + $0x28] sm:$0xff] (!%p1605_p5) }
 0x1c3   : > { %v2080_v63 = vpack.c.bf16 (!%p1605_p5), %v756_v62, %v755_v60  ;;  %v2084_v2 = vpack.c.bf16 (!%p1605_p5), %v758_v1, %v757_v0  ;;  %v759_v3 = vld [vmem:[%s2884_s12 + $0x30] sm:$0xff] (!%p1605_p5)  ;;  %v760_v4 = vld [vmem:[%s2884_s12 + $0x38] sm:$0xff] (!%p1605_p5)  ;;  %v761_v6 = vld [vmem:[%s2884_s12 + $0x40] sm:$0xff] (!%p1605_p5) }
 0x1c4   : > { %2077 = vmatprep.subr.bf16.mxu0 (!%p1605_p5), %v2076_v61  ;;  %2156 = vmatprep.subr.bf16.mxu1 (!%p1605_p5), %v2076_v61  ;;  %v2088_v5 = vpack.c.bf16 (!%p1605_p5), %v760_v4, %v759_v3  ;;  %v762_v7 = vld [vmem:[%s2884_s12 + $0x48] sm:$0xff] (!%p1605_p5)  ;;  %v763_v9 = vld [vmem:[%s2884_s12 + $0x50] sm:$0xff] (!%p1605_p5)  ;;  %v764_v10 = vld [vmem:[%s2884_s12 + $0x58] sm:$0xff] (!%p1605_p5) }
 0x1c5   : > { %2079 = vmatpush3.bf16.msra.mxu0 (!%p1605_p5), %v2076_v61  ;;  %2164 = vmatpush3.bf16.msra.mxu1 (!%p1605_p5), %v2076_v61  ;;  %v2092_v8 = vpack.c.bf16 (!%p1605_p5), %v762_v7, %v761_v6  ;;  %v2096_v11 = vpack.c.bf16 (!%p1605_p5), %v764_v10, %v763_v9  ;;  %v765_v12 = vld [vmem:[%s2884_s12 + $0x60] sm:$0xff] (!%p1605_p5)  ;;  %v766_v13 = vld [vmem:[%s2884_s12 + $0x68] sm:$0xff] (!%p1605_p5)  ;;  %v767_v15 = vld [vmem:[%s2884_s12 + $0x70] sm:$0xff] (!%p1605_p5) }
 0x1c6   : > { %2081 = vmatprep.subr.bf16.mxu0 (!%p1605_p5), %v2080_v63  ;;  %2157 = vmatprep.subr.bf16.mxu1 (!%p1605_p5), %v2080_v63  ;;  %v2100_v14 = vpack.c.bf16 (!%p1605_p5), %v766_v13, %v765_v12  ;;  %v768_v16 = vld [vmem:[%s2884_s12 + $0x78] sm:$0xff] (!%p1605_p5)  ;;  %v707_v24 = vld [vmem:[#allocation3 + $0x20] sm:$0xff] (!%p1605_p5)  ;;  %v708_v26 = vld [vmem:[#allocation3 + $0x28] sm:$0xff] (!%p1605_p5) }
 0x1c7   : > { %v2104_v17 = vpack.c.bf16 %v768_v16, %v767_v15  ;;  %v706_v22 = vld [vmem:[#allocation3 + $0x18] sm:$0xff]  ;;  %v731_v25 = vld [vmem:[#allocation3 + $0xe0] sm:$0xff]  ;;  %v732_v27 = vld [vmem:[#allocation3 + $0xe8] sm:$0xff] }
 0x1c8   : > { %v730_v23 = vld [vmem:[#allocation3 + $0xd8] sm:$0xff]  ;;  %v709_v28 = vld [vmem:[#allocation3 + $0x30] sm:$0xff]  ;;  %v711_v32 = vld [vmem:[#allocation3 + $0x40] sm:$0xff] }
 0x1c9   : > { %2083 = vmatpush3.bf16.msra.mxu0 %v2080_v63  ;;  %2165 = vmatpush3.bf16.msra.mxu1 %v2080_v63  ;;  %v733_v29 = vld [vmem:[#allocation3 + $0xf0] sm:$0xff]  ;;  %v710_v30 = vld [vmem:[#allocation3 + $0x38] sm:$0xff]  ;;  %v735_v33 = vld [vmem:[#allocation3 + $0x100] sm:$0xff] }
 0x1ca   : > { %2085 = vmatprep.subr.bf16.mxu0 %v2084_v2  ;;  %2158 = vmatprep.subr.bf16.mxu1 %v2084_v2  ;;  %v734_v31 = vld [vmem:[#allocation3 + $0xf8] sm:$0xff]  ;;  %v712_v34 = vld [vmem:[#allocation3 + $0x48] sm:$0xff]  ;;  %v713_v36 = vld [vmem:[#allocation3 + $0x50] sm:$0xff] }
 0x1cb   : > { %v736_v35 = vld [vmem:[#allocation3 + $0x108] sm:$0xff]  ;;  %v737_v37 = vld [vmem:[#allocation3 + $0x110] sm:$0xff]  ;;  %v714_v38 = vld [vmem:[#allocation3 + $0x58] sm:$0xff] }
 0x1cc   : > { %v738_v39 = vld [vmem:[#allocation3 + $0x118] sm:$0xff]  ;;  %v715_v40 = vld [vmem:[#allocation3 + $0x60] sm:$0xff]  ;;  %v716_v42 = vld [vmem:[#allocation3 + $0x68] sm:$0xff] }
 0x1cd   : > { %2087 = vmatpush3.bf16.msra.mxu0 %v2084_v2  ;;  %2166 = vmatpush3.bf16.msra.mxu1 %v2084_v2  ;;  %v739_v41 = vld [vmem:[#allocation3 + $0x120] sm:$0xff]  ;;  %v740_v43 = vld [vmem:[#allocation3 + $0x128] sm:$0xff]  ;;  %v717_v44 = vld [vmem:[#allocation3 + $0x70] sm:$0xff] }
 0x1ce   : > { %2089 = vmatprep.subr.bf16.mxu0 %v2088_v5  ;;  %2159 = vmatprep.subr.bf16.mxu1 %v2088_v5  ;;  %v741_v45 = vld [vmem:[#allocation3 + $0x130] sm:$0xff]  ;;  %v718_v46 = vld [vmem:[#allocation3 + $0x78] sm:$0xff]  ;;  %v719_v48 = vld [vmem:[#allocation3 + $0x80] sm:$0xff] }
 0x1cf   : > { %v742_v47 = vld [vmem:[#allocation3 + $0x138] sm:$0xff]  ;;  %v743_v49 = vld [vmem:[#allocation3 + $0x140] sm:$0xff]  ;;  %v720_v50 = vld [vmem:[#allocation3 + $0x88] sm:$0xff] }
 0x1d0   : > { %v744_v51 = vld [vmem:[#allocation3 + $0x148] sm:$0xff]  ;;  %v721_v52 = vld [vmem:[#allocation3 + $0x90] sm:$0xff]  ;;  %v722_v54 = vld [vmem:[#allocation3 + $0x98] sm:$0xff] }
 0x1d1   : > { %2091 = vmatpush3.bf16.msra.mxu0 %v2088_v5  ;;  %2167 = vmatpush3.bf16.msra.mxu1 %v2088_v5  ;;  %v745_v53 = vld [vmem:[#allocation3 + $0x150] sm:$0xff]  ;;  %v746_v55 = vld [vmem:[#allocation3 + $0x158] sm:$0xff]  ;;  %v723_v56 = vld [vmem:[#allocation3 + $0xa0] sm:$0xff] }
 0x1d2   : > { %2093 = vmatprep.subr.bf16.mxu0 %v2092_v8  ;;  %2160 = vmatprep.subr.bf16.mxu1 %v2092_v8  ;;  %v747_v57 = vld [vmem:[#allocation3 + $0x160] sm:$0xff]  ;;  %v724_v58 = vld [vmem:[#allocation3 + $0xa8] sm:$0xff]  ;;  %v725_v60 = vld [vmem:[#allocation3 + $0xb0] sm:$0xff] }
 0x1d3   : > { %v748_v59 = vld [vmem:[#allocation3 + $0x168] sm:$0xff]  ;;  %v749_v61 = vld [vmem:[#allocation3 + $0x170] sm:$0xff]  ;;  %v726_v62 = vld [vmem:[#allocation3 + $0xb8] sm:$0xff] }
 0x1d4   : > { %v750_v63 = vld [vmem:[#allocation3 + $0x178] sm:$0xff] }
 0x1d5   : > { %2095 = vmatpush3.bf16.msra.mxu0 %v2092_v8  ;;  %2168 = vmatpush3.bf16.msra.mxu1 %v2092_v8 }
 0x1d6   : > { %2097 = vmatprep.subr.bf16.mxu0 %v2096_v11  ;;  %2161 = vmatprep.subr.bf16.mxu1 %v2096_v11 }
 0x1d9   : > { %2099 = vmatpush3.bf16.msra.mxu0 %v2096_v11  ;;  %2169 = vmatpush3.bf16.msra.mxu1 %v2096_v11 }
 0x1da   : > { %2101 = vmatprep.subr.bf16.mxu0 %v2100_v14  ;;  %2162 = vmatprep.subr.bf16.mxu1 %v2100_v14 }
 0x1dd   : > { %2103 = vmatpush3.bf16.msra.mxu0 %v2100_v14  ;;  %2170 = vmatpush3.bf16.msra.mxu1 %v2100_v14 }
 0x1de   : > { %2105 = vmatprep.subr.bf16.mxu0 %v2104_v17  ;;  %2163 = vmatprep.subr.bf16.mxu1 %v2104_v17 }
 0x1e1   : > { %2107 = vmatpush3.bf16.msra.mxu0 %v2104_v17  ;;  %2171 = vmatpush3.bf16.msra.mxu1 %v2104_v17 }
 0x1e4   : > { %1917 = vmatmul.mubr.f32.vlgmr.msra.gmra.mrb[0].mxu0 %v704_v18  ;;  %1953 = vmatmul.mubr.f32.vlgmr.msra.gmra.mrb[0].mxu1 %v728_v19 }
 0x1e5   : > { %1919 = vmatprep.mubr.f32.mxu0 %v705_v20  ;;  %1955 = vmatprep.mubr.f32.mxu1 %v729_v21 }
 0x1e8   : > { %1920 = vmatmul.mubr.f32.gmra.mrb[2].mxu0 %v706_v22  ;;  %1956 = vmatmul.mubr.f32.gmra.mrb[2].mxu1 %v730_v23 }
 0x1e9   : > { %1922 = vmatprep.mubr.f32.mxu0 %v707_v24  ;;  %1958 = vmatprep.mubr.f32.mxu1 %v731_v25 }
 0x1ec   : > { %1923 = vmatmul.mubr.f32.gmra.mrb[4].mxu0 %v708_v26  ;;  %1959 = vmatmul.mubr.f32.gmra.mrb[4].mxu1 %v732_v27 }
 0x1ed   : > { %1925 = vmatprep.mubr.f32.mxu0 %v709_v28  ;;  %1961 = vmatprep.mubr.f32.mxu1 %v733_v29 }
 0x1f0   : > { %1926 = vmatmul.mubr.f32.gmra.mrb[6].mxu0 %v710_v30  ;;  %1962 = vmatmul.mubr.f32.gmra.mrb[6].mxu1 %v734_v31 }
 0x1f1   : > { %1928 = vmatprep.mubr.f32.mxu0 %v711_v32  ;;  %1964 = vmatprep.mubr.f32.mxu1 %v735_v33 }
 0x1f4   : > { %1929 = vmatmul.mubr.f32.gmra.mrb[8].mxu0 %v712_v34  ;;  %1965 = vmatmul.mubr.f32.gmra.mrb[8].mxu1 %v736_v35 }
 0x1f5   : > { %1931 = vmatprep.mubr.f32.mxu0 %v713_v36  ;;  %1967 = vmatprep.mubr.f32.mxu1 %v737_v37 }
 0x1f8   : > { %1932 = vmatmul.mubr.f32.gmra.mrb[10].mxu0 %v714_v38  ;;  %1968 = vmatmul.mubr.f32.gmra.mrb[10].mxu1 %v738_v39 }
 0x1f9   : > { %1934 = vmatprep.mubr.f32.mxu0 %v715_v40  ;;  %1970 = vmatprep.mubr.f32.mxu1 %v739_v41 }
 0x1fc   : > { %1935 = vmatmul.mubr.f32.gmra.mrb[12].mxu0 %v716_v42  ;;  %1971 = vmatmul.mubr.f32.gmra.mrb[12].mxu1 %v740_v43 }
 0x1fd   : > { %1937 = vmatprep.mubr.f32.mxu0 %v717_v44  ;;  %1973 = vmatprep.mubr.f32.mxu1 %v741_v45 }
 0x200   : > { %1938 = vmatmul.mubr.f32.gmra.mrb[14].mxu0 %v718_v46  ;;  %1974 = vmatmul.mubr.f32.gmra.mrb[14].mxu1 %v742_v47 }
 0x201   : > { %1940 = vmatprep.mubr.f32.mxu0 %v719_v48  ;;  %1976 = vmatprep.mubr.f32.mxu1 %v743_v49 }
 0x204   : > { %1941 = vmatmul.mubr.f32.gmra.mrb[16].mxu0 %v720_v50  ;;  %1977 = vmatmul.mubr.f32.gmra.mrb[16].mxu1 %v744_v51 }
 0x205   : > { %1943 = vmatprep.mubr.f32.mxu0 %v721_v52  ;;  %1979 = vmatprep.mubr.f32.mxu1 %v745_v53 }
 0x208   : > { %1944 = vmatmul.mubr.f32.gmra.mrb[18].mxu0 %v722_v54  ;;  %1980 = vmatmul.mubr.f32.gmra.mrb[18].mxu1 %v746_v55 }
 0x209   : > { %1946 = vmatprep.mubr.f32.mxu0 %v723_v56  ;;  %1982 = vmatprep.mubr.f32.mxu1 %v747_v57 }
 0x20c   : > { %1947 = vmatmul.mubr.f32.gmra.mrb[20].mxu0 %v724_v58  ;;  %1983 = vmatmul.mubr.f32.gmra.mrb[20].mxu1 %v748_v59 }
 0x20d   : > { %1949 = vmatprep.mubr.f32.mxu0 %v725_v60  ;;  %1985 = vmatprep.mubr.f32.mxu1 %v749_v61 }
 0x210   : > { %1950 = vmatmul.mubr.f32.gmra.mrb[22].mxu0 %v726_v62  ;;  %1986 = vmatmul.mubr.f32.gmra.mrb[22].mxu1 %v750_v63 }
 0x2b7   : > { %v1918_v0 = vpop.f32.mrb[0].mxu0  ;;  %v1954_v1 = vpop.f32.mrb[0].mxu1 }
 0x2b8   : > { %1075 = vst [vmem:[#allocation2 + $0x8] sm:$0xff] %v1918_v0  ;;  %1099 = vst [vmem:[#allocation2 + $0xc8] sm:$0xff] %v1954_v1  ;;  %v835_v2 = vpop.f32.mrb[1].mxu0  ;;  %v955_v3 = vpop.f32.mrb[1].mxu1 }
 0x2b9   : > { %1074 = vst [vmem:[#allocation2] sm:$0xff] %v835_v2  ;;  %1098 = vst [vmem:[#allocation2 + $0xc0] sm:$0xff] %v955_v3 }
 0x2bb   : > { %v1921_v4 = vpop.f32.mrb[2].mxu0  ;;  %v1957_v5 = vpop.f32.mrb[2].mxu1 }
 0x2bc   : > { %1077 = vst [vmem:[#allocation2 + $0x18] sm:$0xff] %v1921_v4  ;;  %1101 = vst [vmem:[#allocation2 + $0xd8] sm:$0xff] %v1957_v5  ;;  %v845_v6 = vpop.f32.mrb[3].mxu0  ;;  %v965_v7 = vpop.f32.mrb[3].mxu1 }
 0x2bd   : > { %1076 = vst [vmem:[#allocation2 + $0x10] sm:$0xff] %v845_v6  ;;  %1100 = vst [vmem:[#allocation2 + $0xd0] sm:$0xff] %v965_v7 }
 0x2bf   : > { %v1924_v8 = vpop.f32.mrb[4].mxu0  ;;  %v1960_v9 = vpop.f32.mrb[4].mxu1 }
 0x2c0   : > { %1079 = vst [vmem:[#allocation2 + $0x28] sm:$0xff] %v1924_v8  ;;  %1103 = vst [vmem:[#allocation2 + $0xe8] sm:$0xff] %v1960_v9  ;;  %v855_v10 = vpop.f32.mrb[5].mxu0  ;;  %v975_v11 = vpop.f32.mrb[5].mxu1 }
 0x2c1   : > { %1078 = vst [vmem:[#allocation2 + $0x20] sm:$0xff] %v855_v10  ;;  %1102 = vst [vmem:[#allocation2 + $0xe0] sm:$0xff] %v975_v11 }
 0x2c3   : > { %v1927_v12 = vpop.f32.mrb[6].mxu0  ;;  %v1963_v13 = vpop.f32.mrb[6].mxu1 }
 0x2c4   : > { %1081 = vst [vmem:[#allocation2 + $0x38] sm:$0xff] %v1927_v12  ;;  %1105 = vst [vmem:[#allocation2 + $0xf8] sm:$0xff] %v1963_v13  ;;  %v865_v14 = vpop.f32.mrb[7].mxu0  ;;  %v985_v15 = vpop.f32.mrb[7].mxu1 }
 0x2c5   : > { %1080 = vst [vmem:[#allocation2 + $0x30] sm:$0xff] %v865_v14  ;;  %1104 = vst [vmem:[#allocation2 + $0xf0] sm:$0xff] %v985_v15 }
 0x2c7   : > { %v1930_v16 = vpop.f32.mrb[8].mxu0  ;;  %v1966_v17 = vpop.f32.mrb[8].mxu1 }
 0x2c8   : > { %1083 = vst [vmem:[#allocation2 + $0x48] sm:$0xff] %v1930_v16  ;;  %1107 = vst [vmem:[#allocation2 + $0x108] sm:$0xff] %v1966_v17  ;;  %v875_v18 = vpop.f32.mrb[9].mxu0  ;;  %v995_v19 = vpop.f32.mrb[9].mxu1 }
 0x2c9   : > { %1082 = vst [vmem:[#allocation2 + $0x40] sm:$0xff] %v875_v18  ;;  %1106 = vst [vmem:[#allocation2 + $0x100] sm:$0xff] %v995_v19 }
 0x2cb   : > { %v1933_v20 = vpop.f32.mrb[10].mxu0  ;;  %v1969_v21 = vpop.f32.mrb[10].mxu1 }
 0x2cc   : > { %1085 = vst [vmem:[#allocation2 + $0x58] sm:$0xff] %v1933_v20  ;;  %1109 = vst [vmem:[#allocation2 + $0x118] sm:$0xff] %v1969_v21  ;;  %v885_v22 = vpop.f32.mrb[11].mxu0  ;;  %v1005_v23 = vpop.f32.mrb[11].mxu1 }
 0x2cd   : > { %1084 = vst [vmem:[#allocation2 + $0x50] sm:$0xff] %v885_v22  ;;  %1108 = vst [vmem:[#allocation2 + $0x110] sm:$0xff] %v1005_v23 }
 0x2cf   : > { %v1936_v24 = vpop.f32.mrb[12].mxu0  ;;  %v1972_v25 = vpop.f32.mrb[12].mxu1 }
 0x2d0   : > { %1087 = vst [vmem:[#allocation2 + $0x68] sm:$0xff] %v1936_v24  ;;  %1111 = vst [vmem:[#allocation2 + $0x128] sm:$0xff] %v1972_v25  ;;  %v895_v26 = vpop.f32.mrb[13].mxu0  ;;  %v1015_v27 = vpop.f32.mrb[13].mxu1 }
 0x2d1   : > { %1086 = vst [vmem:[#allocation2 + $0x60] sm:$0xff] %v895_v26  ;;  %1110 = vst [vmem:[#allocation2 + $0x120] sm:$0xff] %v1015_v27 }
 0x2d3   : > { %v1939_v28 = vpop.f32.mrb[14].mxu0  ;;  %v1975_v29 = vpop.f32.mrb[14].mxu1 }
 0x2d4   : > { %1089 = vst [vmem:[#allocation2 + $0x78] sm:$0xff] %v1939_v28  ;;  %1113 = vst [vmem:[#allocation2 + $0x138] sm:$0xff] %v1975_v29  ;;  %v905_v30 = vpop.f32.mrb[15].mxu0  ;;  %v1025_v31 = vpop.f32.mrb[15].mxu1 }
 0x2d5   : > { %1088 = vst [vmem:[#allocation2 + $0x70] sm:$0xff] %v905_v30  ;;  %1112 = vst [vmem:[#allocation2 + $0x130] sm:$0xff] %v1025_v31 }
 0x2d7   : > { %v1942_v32 = vpop.f32.mrb[16].mxu0  ;;  %v1978_v33 = vpop.f32.mrb[16].mxu1 }
 0x2d8   : > { %1091 = vst [vmem:[#allocation2 + $0x88] sm:$0xff] %v1942_v32  ;;  %1115 = vst [vmem:[#allocation2 + $0x148] sm:$0xff] %v1978_v33  ;;  %v915_v34 = vpop.f32.mrb[17].mxu0  ;;  %v1035_v35 = vpop.f32.mrb[17].mxu1 }
 0x2d9   : > { %1090 = vst [vmem:[#allocation2 + $0x80] sm:$0xff] %v915_v34  ;;  %1114 = vst [vmem:[#allocation2 + $0x140] sm:$0xff] %v1035_v35 }
 0x2db   : > { %v1945_v36 = vpop.f32.mrb[18].mxu0  ;;  %v1981_v37 = vpop.f32.mrb[18].mxu1 }
 0x2dc   : > { %1093 = vst [vmem:[#allocation2 + $0x98] sm:$0xff] %v1945_v36  ;;  %1117 = vst [vmem:[#allocation2 + $0x158] sm:$0xff] %v1981_v37  ;;  %v925_v38 = vpop.f32.mrb[19].mxu0  ;;  %v1045_v39 = vpop.f32.mrb[19].mxu1 }
 0x2dd   : > { %1092 = vst [vmem:[#allocation2 + $0x90] sm:$0xff] %v925_v38  ;;  %1116 = vst [vmem:[#allocation2 + $0x150] sm:$0xff] %v1045_v39 }
 0x2df   : > { %v1948_v40 = vpop.f32.mrb[20].mxu0  ;;  %v1984_v41 = vpop.f32.mrb[20].mxu1 }
 0x2e0   : > { %1095 = vst [vmem:[#allocation2 + $0xa8] sm:$0xff] %v1948_v40  ;;  %1119 = vst [vmem:[#allocation2 + $0x168] sm:$0xff] %v1984_v41  ;;  %v935_v42 = vpop.f32.mrb[21].mxu0  ;;  %v1055_v43 = vpop.f32.mrb[21].mxu1 }
 0x2e1   : > { %1094 = vst [vmem:[#allocation2 + $0xa0] sm:$0xff] %v935_v42  ;;  %1118 = vst [vmem:[#allocation2 + $0x160] sm:$0xff] %v1055_v43 }
 0x2e3   : > { %v1951_v44 = vpop.f32.mrb[22].mxu0  ;;  %v1987_v45 = vpop.f32.mrb[22].mxu1 }
 0x2e4   : > { %1097 = vst [vmem:[#allocation2 + $0xb8] sm:$0xff] %v1951_v44  ;;  %1121 = vst [vmem:[#allocation2 + $0x178] sm:$0xff] %v1987_v45  ;;  %v945_v46 = vpop.f32.mrb[23].mxu0  ;;  %v1065_v47 = vpop.f32.mrb[23].mxu1 }
 0x2e5   : > { %1096 = vst [vmem:[#allocation2 + $0xb0] sm:$0xff] %v945_v46  ;;  %1120 = vst [vmem:[#allocation2 + $0x170] sm:$0xff] %v1065_v47 }
 0x2e6 PF: > { %p1607_p12 = scmp.ne.s32.totalorder %s2537_s21, 0 }
 0x2e7   : > { %s3092_s29 = sld [smem:[#allocation23_spill]] (!%p1607_p12) }
 0x2e8   : > { %1124 = sbr.rel (%p1607_p12) target bundleno = 759 (0x2f7), region = 64 }
 0x2ed   : > { %s1125_s7 = scalar_lea.vmem (!%p1607_p12), %s3092_s29, %s2545_s23 }
 0x2ee   : > { %v1608_v48 = vld [vmem:[%s1125_s7] ss:$0 sm:$0xff] (!%p1607_p12) }
 0x2ef   : > { %1133 = vst [vmem:[#allocation4] sm:$0xff] %v1608_v48  ;;  %1134 = vst [vmem:[#allocation4 + $0x8] sm:$0xff] %v1608_v48 }
 0x2f0   : > { %1135 = vst [vmem:[#allocation4 + $0x10] sm:$0xff] %v1608_v48  ;;  %1136 = vst [vmem:[#allocation4 + $0x18] sm:$0xff] %v1608_v48 }
 0x2f1   : > { %1137 = vst [vmem:[#allocation4 + $0x20] sm:$0xff] %v1608_v48  ;;  %1138 = vst [vmem:[#allocation4 + $0x28] sm:$0xff] %v1608_v48 }
 0x2f2   : > { %1139 = vst [vmem:[#allocation4 + $0x30] sm:$0xff] %v1608_v48  ;;  %1140 = vst [vmem:[#allocation4 + $0x38] sm:$0xff] %v1608_v48 }
 0x2f3   : > { %1141 = vst [vmem:[#allocation4 + $0x40] sm:$0xff] %v1608_v48  ;;  %1142 = vst [vmem:[#allocation4 + $0x48] sm:$0xff] %v1608_v48 }
 0x2f4   : > { %1143 = vst [vmem:[#allocation4 + $0x50] sm:$0xff] %v1608_v48  ;;  %1144 = vst [vmem:[#allocation4 + $0x58] sm:$0xff] %v1608_v48 }
 0x2f5   : > { %1145 = vst [vmem:[#allocation4 + $0x60] sm:$0xff] %v1608_v48  ;;  %1146 = vst [vmem:[#allocation4 + $0x68] sm:$0xff] %v1608_v48 }
 0x2f6   : > { %1147 = vst [vmem:[#allocation4 + $0x70] sm:$0xff] %v1608_v48  ;;  %1148 = vst [vmem:[#allocation4 + $0x78] sm:$0xff] %v1608_v48 }
 0x2f7 PF: > { %s1609_s1 = sshll.u32 %s2537_s21, 7  ;;  %v1166_v49 = vld [vmem:[%s2845_s10] sm:$0xff]  ;;  %v1167_v11 = vld [vmem:[%s2845_s10 + $0x8] sm:$0xff]  ;;  %v1168_v13 = vld [vmem:[%s2845_s10 + $0x10] sm:$0xff]  ;;  %p1610_p11 = scmp.ne.s32.totalorder %s2537_s21, 2 }
 0x2f8   : > { %v1174_v50 = vld [vmem:[%s2845_s10 + $0x40] sm:$0xff]  ;;  %2020 = vmatprep.mubr.f32.mxu0 %v1166_v49  ;;  %s2910_s15 = scalar_lea.vmem [#allocation2], %s1609_s1  ;;  %v1175_v12 = vld [vmem:[%s2845_s10 + $0x48] sm:$0xff]  ;;  %v1176_v14 = vld [vmem:[%s2845_s10 + $0x50] sm:$0xff]  ;;  %p1611_p13 = scmp.eq.s32.totalorder (!%p1610_p11), %s2545_s23, 2 }
 0x2f9   : > { %2032 = vmatprep.mubr.f32.mxu1 %v1174_v50  ;;  %v1183_v51 = vld [vmem:[%s2910_s15] sm:$0xff]  ;;  %v1184_v52 = vld [vmem:[%s2910_s15 + $0x8] sm:$0xff]  ;;  %v1185_v53 = vld [vmem:[%s2910_s15 + $0x10] sm:$0xff] }
 0x2fa   : > { %v2108_v54 = vpack.c.bf16 %v1184_v52, %v1183_v51  ;;  %v1186_v55 = vld [vmem:[%s2910_s15 + $0x18] sm:$0xff]  ;;  %v1187_v57 = vld [vmem:[%s2910_s15 + $0x20] sm:$0xff]  ;;  %v1188_v58 = vld [vmem:[%s2910_s15 + $0x28] sm:$0xff] }
 0x2fb   : > { %v2112_v56 = vpack.c.bf16 %v1186_v55, %v1185_v53  ;;  %v2116_v59 = vpack.c.bf16 %v1188_v58, %v1187_v57  ;;  %v1189_v60 = vld [vmem:[%s2910_s15 + $0x30] sm:$0xff]  ;;  %v1190_v61 = vld [vmem:[%s2910_s15 + $0x38] sm:$0xff]  ;;  %v1191_v63 = vld [vmem:[%s2910_s15 + $0x40] sm:$0xff] }
 0x2fc   : > { %2109 = vmatprep.subr.bf16.mxu0 %v2108_v54  ;;  %2172 = vmatprep.subr.bf16.mxu1 %v2108_v54  ;;  %v2120_v62 = vpack.c.bf16 %v1190_v61, %v1189_v60  ;;  %v1192_v0 = vld [vmem:[%s2910_s15 + $0x48] sm:$0xff]  ;;  %v1193_v2 = vld [vmem:[%s2910_s15 + $0x50] sm:$0xff]  ;;  %v1194_v3 = vld [vmem:[%s2910_s15 + $0x58] sm:$0xff] }
 0x2fd   : > { %2111 = vmatpush3.bf16.msra.mxu0 %v2108_v54  ;;  %2180 = vmatpush3.bf16.msra.mxu1 %v2108_v54  ;;  %v2124_v1 = vpack.c.bf16 %v1192_v0, %v1191_v63  ;;  %v2128_v4 = vpack.c.bf16 %v1194_v3, %v1193_v2  ;;  %v1195_v5 = vld [vmem:[%s2910_s15 + $0x60] sm:$0xff]  ;;  %v1196_v6 = vld [vmem:[%s2910_s15 + $0x68] sm:$0xff]  ;;  %v1197_v8 = vld [vmem:[%s2910_s15 + $0x70] sm:$0xff] }
 0x2fe   : > { %2113 = vmatprep.subr.bf16.mxu0 %v2112_v56  ;;  %2173 = vmatprep.subr.bf16.mxu1 %v2112_v56  ;;  %v2132_v7 = vpack.c.bf16 %v1196_v6, %v1195_v5  ;;  %v1198_v9 = vld [vmem:[%s2910_s15 + $0x78] sm:$0xff]  ;;  %v1170_v17 = vld [vmem:[%s2845_s10 + $0x20] sm:$0xff]  ;;  %v1171_v19 = vld [vmem:[%s2845_s10 + $0x28] sm:$0xff] }
 0x2ff   : > { %v2136_v10 = vpack.c.bf16 %v1198_v9, %v1197_v8  ;;  %v1169_v15 = vld [vmem:[%s2845_s10 + $0x18] sm:$0xff]  ;;  %v1178_v18 = vld [vmem:[%s2845_s10 + $0x60] sm:$0xff]  ;;  %v1179_v20 = vld [vmem:[%s2845_s10 + $0x68] sm:$0xff] }
 0x300   : > { %v1177_v16 = vld [vmem:[%s2845_s10 + $0x58] sm:$0xff]  ;;  %v1172_v21 = vld [vmem:[%s2845_s10 + $0x30] sm:$0xff]  ;;  %v1151_v25 = vld [vmem:[#allocation4 + $0x8] sm:$0xff] }
 0x301   : > { %2115 = vmatpush3.bf16.msra.mxu0 %v2112_v56  ;;  %2181 = vmatpush3.bf16.msra.mxu1 %v2112_v56  ;;  %v1180_v22 = vld [vmem:[%s2845_s10 + $0x70] sm:$0xff]  ;;  %v1173_v23 = vld [vmem:[%s2845_s10 + $0x38] sm:$0xff]  ;;  %v1159_v26 = vld [vmem:[#allocation4 + $0x48] sm:$0xff] }
 0x302   : > { %2117 = vmatprep.subr.bf16.mxu0 %v2116_v59  ;;  %2174 = vmatprep.subr.bf16.mxu1 %v2116_v59  ;;  %v1181_v24 = vld [vmem:[%s2845_s10 + $0x78] sm:$0xff]  ;;  %v1150_v27 = vld [vmem:[#allocation4] sm:$0xff]  ;;  %v1152_v39 = vld [vmem:[#allocation4 + $0x10] sm:$0xff] }
 0x303   : > { %v1158_v28 = vld [vmem:[#allocation4 + $0x40] sm:$0xff]  ;;  %v1153_v37 = vld [vmem:[#allocation4 + $0x18] sm:$0xff]  ;;  %v1160_v40 = vld [vmem:[#allocation4 + $0x50] sm:$0xff] }
 0x304   : > { %v1161_v38 = vld [vmem:[#allocation4 + $0x58] sm:$0xff]  ;;  %v1155_v49 = vld [vmem:[#allocation4 + $0x28] sm:$0xff]  ;;  %v1154_v51 = vld [vmem:[#allocation4 + $0x20] sm:$0xff] }
 0x305   : > { %2119 = vmatpush3.bf16.msra.mxu0 %v2116_v59  ;;  %2182 = vmatpush3.bf16.msra.mxu1 %v2116_v59  ;;  %v1163_v50 = vld [vmem:[#allocation4 + $0x68] sm:$0xff]  ;;  %v1162_v52 = vld [vmem:[#allocation4 + $0x60] sm:$0xff]  ;;  %v1157_v61 = vld [vmem:[#allocation4 + $0x38] sm:$0xff] }
 0x306   : > { %2121 = vmatprep.subr.bf16.mxu0 %v2120_v62  ;;  %2175 = vmatprep.subr.bf16.mxu1 %v2120_v62  ;;  %v1156_v63 = vld [vmem:[#allocation4 + $0x30] sm:$0xff] }
 0x307   : > { %v1164_v0 = vld [vmem:[#allocation4 + $0x70] sm:$0xff] }
 0x309   : > { %2123 = vmatpush3.bf16.msra.mxu0 %v2120_v62  ;;  %2183 = vmatpush3.bf16.msra.mxu1 %v2120_v62  ;;  %v1165_v62 = vld [vmem:[#allocation4 + $0x78] sm:$0xff] }
 0x30a   : > { %2125 = vmatprep.subr.bf16.mxu0 %v2124_v1  ;;  %2176 = vmatprep.subr.bf16.mxu1 %v2124_v1 }
 0x30d   : > { %2127 = vmatpush3.bf16.msra.mxu0 %v2124_v1  ;;  %2184 = vmatpush3.bf16.msra.mxu1 %v2124_v1 }
 0x30e   : > { %2129 = vmatprep.subr.bf16.mxu0 %v2128_v4  ;;  %2177 = vmatprep.subr.bf16.mxu1 %v2128_v4 }
 0x311   : > { %2131 = vmatpush3.bf16.msra.mxu0 %v2128_v4  ;;  %2185 = vmatpush3.bf16.msra.mxu1 %v2128_v4 }
 0x312   : > { %2133 = vmatprep.subr.bf16.mxu0 %v2132_v7  ;;  %2178 = vmatprep.subr.bf16.mxu1 %v2132_v7 }
 0x315   : > { %2135 = vmatpush3.bf16.msra.mxu0 %v2132_v7  ;;  %2186 = vmatpush3.bf16.msra.mxu1 %v2132_v7 }
 0x316   : > { %2137 = vmatprep.subr.bf16.mxu0 %v2136_v10  ;;  %2179 = vmatprep.subr.bf16.mxu1 %v2136_v10 }
 0x319   : > { %2139 = vmatpush3.bf16.msra.mxu0 %v2136_v10  ;;  %2187 = vmatpush3.bf16.msra.mxu1 %v2136_v10 }
 0x31c   : > { %2021 = vmatmul.mubr.f32.vlgmr.msra.gmra.mrb[0].mxu0 %v1167_v11  ;;  %2033 = vmatmul.mubr.f32.vlgmr.msra.gmra.mrb[0].mxu1 %v1175_v12 }
 0x31d   : > { %2023 = vmatprep.mubr.f32.mxu0 %v1168_v13  ;;  %2035 = vmatprep.mubr.f32.mxu1 %v1176_v14 }
 0x320   : > { %2024 = vmatmul.mubr.f32.gmra.mrb[2].mxu0 %v1169_v15  ;;  %2036 = vmatmul.mubr.f32.gmra.mrb[2].mxu1 %v1177_v16 }
 0x321   : > { %2026 = vmatprep.mubr.f32.mxu0 %v1170_v17  ;;  %2038 = vmatprep.mubr.f32.mxu1 %v1178_v18 }
 0x324   : > { %2027 = vmatmul.mubr.f32.gmra.mrb[4].mxu0 %v1171_v19  ;;  %2039 = vmatmul.mubr.f32.gmra.mrb[4].mxu1 %v1179_v20 }
 0x325   : > { %2029 = vmatprep.mubr.f32.mxu0 %v1172_v21  ;;  %2041 = vmatprep.mubr.f32.mxu1 %v1180_v22 }
 0x328   : > { %2030 = vmatmul.mubr.f32.gmra.mrb[6].mxu0 %v1173_v23  ;;  %2042 = vmatmul.mubr.f32.gmra.mrb[6].mxu1 %v1181_v24 }
 0x3ef   : > { %v2022_v29 = vpop.f32.mrb[0].mxu0  ;;  %v2034_v30 = vpop.f32.mrb[0].mxu1 }
 0x3f0   : > { %v1345_v31 = vadd.f32 %v2022_v29, %v1151_v25  ;;  %v1353_v32 = vadd.f32 %v2034_v30, %v1159_v26  ;;  %v1265_v33 = vpop.f32.mrb[1].mxu0  ;;  %v1305_v34 = vpop.f32.mrb[1].mxu1 }
 0x3f1   : > { %v1344_v35 = vadd.f32 %v1265_v33, %v1150_v27  ;;  %v1352_v36 = vadd.f32 %v1305_v34, %v1158_v28 }
 0x3f2   : > { %1361 = vst [vmem:[#allocation4 + $0x8] sm:$0xff] %v1345_v31  ;;  %1369 = vst [vmem:[#allocation4 + $0x48] sm:$0xff] %v1353_v32 }
 0x3f3   : > { %1360 = vst [vmem:[#allocation4] sm:$0xff] %v1344_v35  ;;  %1368 = vst [vmem:[#allocation4 + $0x40] sm:$0xff] %v1352_v36  ;;  %v2025_v41 = vpop.f32.mrb[2].mxu0  ;;  %v2037_v42 = vpop.f32.mrb[2].mxu1 }
 0x3f4   : > { %v1347_v43 = vadd.f32 %v2025_v41, %v1153_v37  ;;  %v1355_v44 = vadd.f32 %v2037_v42, %v1161_v38  ;;  %v1275_v45 = vpop.f32.mrb[3].mxu0  ;;  %v1315_v46 = vpop.f32.mrb[3].mxu1 }
 0x3f5   : > { %v1346_v47 = vadd.f32 %v1275_v45, %v1152_v39  ;;  %v1354_v48 = vadd.f32 %v1315_v46, %v1160_v40 }
 0x3f6   : > { %1363 = vst [vmem:[#allocation4 + $0x18] sm:$0xff] %v1347_v43  ;;  %1371 = vst [vmem:[#allocation4 + $0x58] sm:$0xff] %v1355_v44 }
 0x3f7   : > { %1362 = vst [vmem:[#allocation4 + $0x10] sm:$0xff] %v1346_v47  ;;  %1370 = vst [vmem:[#allocation4 + $0x50] sm:$0xff] %v1354_v48  ;;  %v2028_v53 = vpop.f32.mrb[4].mxu0  ;;  %v2040_v54 = vpop.f32.mrb[4].mxu1 }
 0x3f8   : > { %v1349_v55 = vadd.f32 %v2028_v53, %v1155_v49  ;;  %v1357_v56 = vadd.f32 %v2040_v54, %v1163_v50  ;;  %v1285_v57 = vpop.f32.mrb[5].mxu0  ;;  %v1325_v58 = vpop.f32.mrb[5].mxu1 }
 0x3f9   : > { %v1348_v59 = vadd.f32 %v1285_v57, %v1154_v51  ;;  %v1356_v60 = vadd.f32 %v1325_v58, %v1162_v52  ;;  %1379 = sbr.rel (%p1610_p11) target bundleno = 1044 (0x414), region = 68  ;;  %v1382_v10 = vld [vmem:[#allocation4 + $0x8] sm:$0xff] (!%p1610_p11) }
 0x3fa   : > { %1365 = vst [vmem:[#allocation4 + $0x28] sm:$0xff] %v1349_v55  ;;  %1373 = vst [vmem:[#allocation4 + $0x68] sm:$0xff] %v1357_v56  ;;  %v1381_v9 = vld [vmem:[#allocation4] sm:$0xff] (!%p1610_p11)  ;;  %v1390_v18 = vld [vmem:[#allocation4 + $0x48] sm:$0xff] (!%p1610_p11) }
 0x3fb   : > { %1364 = vst [vmem:[#allocation4 + $0x20] sm:$0xff] %v1348_v59  ;;  %1372 = vst [vmem:[#allocation4 + $0x60] sm:$0xff] %v1356_v60  ;;  %v2031_v1 = vpop.f32.mrb[6].mxu0  ;;  %v2043_v2 = vpop.f32.mrb[6].mxu1  ;;  %v1389_v17 = vld [vmem:[#allocation4 + $0x40] sm:$0xff] (!%p1610_p11) }
 0x3fc   : > { %v1351_v3 = vadd.f32 %v2031_v1, %v1157_v61  ;;  %v1359_v4 = vadd.f32 %v2043_v2, %v1165_v62  ;;  %v1295_v5 = vpop.f32.mrb[7].mxu0  ;;  %v1335_v6 = vpop.f32.mrb[7].mxu1 }
 0x3fd   : > { %v1350_v7 = vadd.f32 %v1295_v5, %v1156_v63  ;;  %v1358_v8 = vadd.f32 %v1335_v6, %v1164_v0  ;;  %v1384_v12 = vld [vmem:[#allocation4 + $0x18] sm:$0xff] (!%p1610_p11) }
 0x3fe   : > { %1367 = vst [vmem:[#allocation4 + $0x38] sm:$0xff] %v1351_v3  ;;  %1375 = vst [vmem:[#allocation4 + $0x78] sm:$0xff] %v1359_v4  ;;  %v1383_v11 = vld [vmem:[#allocation4 + $0x10] sm:$0xff] (!%p1610_p11)  ;;  %v1392_v20 = vld [vmem:[#allocation4 + $0x58] sm:$0xff] (!%p1610_p11) }
 0x3ff   : > { %1366 = vst [vmem:[#allocation4 + $0x30] sm:$0xff] %v1350_v7  ;;  %1374 = vst [vmem:[#allocation4 + $0x70] sm:$0xff] %v1358_v8  ;;  %v1391_v19 = vld [vmem:[#allocation4 + $0x50] sm:$0xff] (!%p1610_p11) }
 0x400   : > { %s1612_s21 = sshll.u32 (!%p1611_p13), %s2541_s22, 7  ;;  %v1402_v25 = vmax.f32 (!%p1611_p13), %v1381_v9, 0.0  ;;  %v1403_v26 = vmax.f32 (!%p1611_p13), %v1382_v10, 0.0  ;;  %v1404_v27 = vmax.f32 (!%p1611_p13), %v1383_v11, 0.0  ;;  %v1405_v28 = vmax.f32 (!%p1611_p13), %v1384_v12, 0.0 }
 0x401   : > { %v1386_v14 = vld [vmem:[#allocation4 + $0x28] sm:$0xff]  ;;  %1400 = sbr.rel (%p1611_p13) target bundleno = 1035 (0x40b), region = 72  ;;  %s1418_s2 = scalar_lea.vmem (!%p1611_p13), [#allocation3], %s1612_s21  ;;  %v1410_v33 = vmax.f32 (!%p1611_p13), %v1389_v17, 0.0  ;;  %v1411_v34 = vmax.f32 (!%p1611_p13), %v1390_v18, 0.0  ;;  %v1412_v35 = vmax.f32 (!%p1611_p13), %v1391_v19, 0.0 }
 0x402   : > { %v1385_v13 = vld [vmem:[#allocation4 + $0x20] sm:$0xff]  ;;  %v1394_v22 = vld [vmem:[#allocation4 + $0x68] sm:$0xff]  ;;  %v1407_v30 = vmax.f32 (!%p1611_p13), %v1386_v14, 0.0  ;;  %1419 = vst [vmem:[%s1418_s2] sm:$0xff] (!%p1611_p13), %v1402_v25  ;;  %1420 = vst [vmem:[%s1418_s2 + $0x8] sm:$0xff] (!%p1611_p13), %v1403_v26  ;;  %v1413_v36 = vmax.f32 (!%p1611_p13), %v1392_v20, 0.0 }
 0x403   : > { %v1393_v21 = vld [vmem:[#allocation4 + $0x60] sm:$0xff]  ;;  %v1406_v29 = vmax.f32 (!%p1611_p13), %v1385_v13, 0.0  ;;  %1421 = vst [vmem:[%s1418_s2 + $0x10] sm:$0xff] (!%p1611_p13), %v1404_v27  ;;  %1422 = vst [vmem:[%s1418_s2 + $0x18] sm:$0xff] (!%p1611_p13), %v1405_v28  ;;  %v1415_v38 = vmax.f32 (!%p1611_p13), %v1394_v22, 0.0 }
 0x404   : > { %1424 = vst [vmem:[%s1418_s2 + $0x28] sm:$0xff] (!%p1611_p13), %v1407_v30  ;;  %v1414_v37 = vmax.f32 (!%p1611_p13), %v1393_v21, 0.0  ;;  %1427 = vst [vmem:[%s1418_s2 + $0x40] sm:$0xff] (!%p1611_p13), %v1410_v33 }
 0x405   : > { %v1388_v16 = vld [vmem:[#allocation4 + $0x38] sm:$0xff]  ;;  %1423 = vst [vmem:[%s1418_s2 + $0x20] sm:$0xff] (!%p1611_p13), %v1406_v29  ;;  %1428 = vst [vmem:[%s1418_s2 + $0x48] sm:$0xff] (!%p1611_p13), %v1411_v34 }
 0x406   : > { %v1387_v15 = vld [vmem:[#allocation4 + $0x30] sm:$0xff]  ;;  %v1396_v24 = vld [vmem:[#allocation4 + $0x78] sm:$0xff]  ;;  %v1409_v32 = vmax.f32 (!%p1611_p13), %v1388_v16, 0.0  ;;  %1429 = vst [vmem:[%s1418_s2 + $0x50] sm:$0xff] (!%p1611_p13), %v1412_v35  ;;  %1430 = vst [vmem:[%s1418_s2 + $0x58] sm:$0xff] (!%p1611_p13), %v1413_v36 }
 0x407   : > { %v1395_v23 = vld [vmem:[#allocation4 + $0x70] sm:$0xff]  ;;  %v1408_v31 = vmax.f32 (!%p1611_p13), %v1387_v15, 0.0  ;;  %v1417_v40 = vmax.f32 (!%p1611_p13), %v1396_v24, 0.0  ;;  %1431 = vst [vmem:[%s1418_s2 + $0x60] sm:$0xff] (!%p1611_p13), %v1414_v37  ;;  %1432 = vst [vmem:[%s1418_s2 + $0x68] sm:$0xff] (!%p1611_p13), %v1415_v38 }
 0x408   : > { %1426 = vst [vmem:[%s1418_s2 + $0x38] sm:$0xff] %v1409_v32  ;;  %v1416_v39 = vmax.f32 %v1395_v23, 0.0 }
 0x409   : > { %1425 = vst [vmem:[%s1418_s2 + $0x30] sm:$0xff] %v1408_v31  ;;  %1434 = vst [vmem:[%s1418_s2 + $0x78] sm:$0xff] %v1417_v40 }
 0x40a   : > { %1433 = vst [vmem:[%s1418_s2 + $0x70] sm:$0xff] %v1416_v39 }
 0x40b PF: > { %p1613_p2 = scmp.ne.s32.totalorder %s2545_s23, 2 }
 0x40c   : > { %1438 = vst [vmem:[%s2860_s9] sm:$0xff] (!%p1613_p2), %v1381_v9  ;;  %1439 = vst [vmem:[%s2860_s9 + $0x8] sm:$0xff] (!%p1613_p2), %v1382_v10 }
 0x40d   : > { %1437 = sbr.rel (%p1613_p2) target bundleno = 1044 (0x414), region = 76  ;;  %1440 = vst [vmem:[%s2860_s9 + $0x10] sm:$0xff] (!%p1613_p2), %v1383_v11  ;;  %1441 = vst [vmem:[%s2860_s9 + $0x18] sm:$0xff] (!%p1613_p2), %v1384_v12 }
 0x40e   : > { %1442 = vst [vmem:[%s2860_s9 + $0x20] sm:$0xff] (!%p1613_p2), %v1385_v13  ;;  %1443 = vst [vmem:[%s2860_s9 + $0x28] sm:$0xff] (!%p1613_p2), %v1386_v14 }
 0x40f   : > { %1444 = vst [vmem:[%s2860_s9 + $0x30] sm:$0xff] (!%p1613_p2), %v1387_v15  ;;  %1445 = vst [vmem:[%s2860_s9 + $0x38] sm:$0xff] (!%p1613_p2), %v1388_v16 }
 0x410   : > { %1446 = vst [vmem:[%s2860_s9 + $0x40] sm:$0xff] (!%p1613_p2), %v1389_v17  ;;  %1447 = vst [vmem:[%s2860_s9 + $0x48] sm:$0xff] (!%p1613_p2), %v1390_v18 }
 0x411   : > { %1448 = vst [vmem:[%s2860_s9 + $0x50] sm:$0xff] (!%p1613_p2), %v1391_v19  ;;  %1449 = vst [vmem:[%s2860_s9 + $0x58] sm:$0xff] (!%p1613_p2), %v1392_v20 }
 0x412   : > { %1450 = vst [vmem:[%s2860_s9 + $0x60] sm:$0xff] (!%p1613_p2), %v1393_v21  ;;  %1451 = vst [vmem:[%s2860_s9 + $0x68] sm:$0xff] (!%p1613_p2), %v1394_v22 }
 0x413   : > { %1452 = vst [vmem:[%s2860_s9 + $0x70] sm:$0xff] (!%p1613_p2), %v1395_v23  ;;  %1453 = vst [vmem:[%s2860_s9 + $0x78] sm:$0xff] (!%p1613_p2), %v1396_v24 }
 0x414 PF: > { %s3093_s23 = sld [smem:[#allocation17_spill]]  ;;  %s1619_s14 = sshll.u32 %s2541_s22, 11 }
 0x415   : > { %s3094_s18 = sld [smem:[#allocation24_spill]]  ;;  %s1468_s6 = sshll.u32 %s2860_s9, 4  ;;  %s2969_s6 = int_to_ptr.vmem [resolvable:$true] %s1468_s6 }
 0x416   : > { %s2973_s12 = scalar_lea.sflag [#allocation7], %s265_s11  ;;  %s2419_s3 = scalar_lea.vmem %s2969_s6, 2048 }
 0x417   : > { %p2420_p4 = scmp.ne.s32.totalorder %s2969_s6, %s2419_s3  ;;  %s2569_s22 = smov [#allocation11]  }
 0x418   : > { %s2423_s4 = sshll.u32 %s2569_s22, 4  ;;  %s2424_s4 = int_to_ptr.vmem [resolvable:$false] %s2423_s4 }
 0x419   : > { %s2425_s29 = scalar_lea.vmem %s2424_s4, 4096  ;;  %p2426_p8 = scmp.lt.s32.totalorder %s2969_s6, %s2424_s4 }
 0x41a   : > { %p3096_p3 = scmp.ne.s32.totalorder %s3093_s23, 0  ;;  %p2427_p0 = scmp.lt.s32.totalorder %s2425_s29, %s2419_s3 }
 0x41b   : > { %s3095_s8 = smov %s3094_s18  ;;  %s2966_s5 = scalar_lea.hbm %s3094_s18, %s1619_s14 }
 0x41c   : > { %p2421_p6 = pnand %p2420_p4, %p3096_p3  ;;  %p2428_p7 = por %p2427_p0, %p2426_p8 }
 0x41e   : > { %p2422_p1 = pneg %p2421_p6 }
 0x420   : > { %p2429_p9 = pnand %p2428_p7, %p2422_p1 }
 0x422   : > { %2432 = shalt.err (!%p2429_p9)
}
 0x423   : > { %s2433_s11 = scalar_lea.hbm %s2966_s5, 2048  ;;  %s2437_s1 = scalar_lea.hbm %s3095_s8, 6144 }
 0x424   : > { %p2434_p10 = scmp.ne.s32.totalorder %s2966_s5, %s2433_s11  ;;  %p2438_p11 = scmp.lt.u32.totalorder %s2966_s5, %s3095_s8 }
 0x425   : > { %p2439_p13 = scmp.lt.u32.totalorder %s2437_s1, %s2433_s11  ;;  %p2441_p4 = scmp.lt.u32.totalorder %s2433_s11, %s2966_s5 }
 0x426   : > { %p2435_p5 = pnand %p2434_p10, %p3096_p3 }
 0x427   : > { %p2440_p2 = por %p2439_p13, %p2438_p11 }
 0x428   : > { %p2436_p12 = pneg %p2435_p5 }
 0x429   : > { %p2442_p6 = por %p2441_p4, %p2440_p2 }
 0x42b   : > { %p2443_p1 = pnand %p2442_p6, %p2436_p12 }
 0x42d   : > { %2446 = shalt.err (!%p2443_p1)
}
 0x42e   : > { %s2570_s2 = smov 128   ;;  %s2571_s14 = smov 8  }
 0x42f   : > { %2199 = dma.vmem_to_hbm [thread:$0]  (%p3096_p3), %s2969_s6, 2048, %s2966_s5, %s2973_s12, %s2570_s2, %s2570_s2, %s2571_s14  }
 0x430 PF: > { %s3097_s13 = sld [smem:[#allocation16_spill]]  ;;  %s3098_s10 = sld [smem:[#allocation15_spill]] }
 0x431   : > { %s3099_s18 = sld [smem:[#allocation18_spill]] }
 0x436   : > { %p2221_p8 = scmp.ge.s32.totalorder %s3097_s13, 2  ;;  %s1483_s3 = sand.u32 1, %s3098_s10  }
 0x437   : > { %p3100_p0 = scmp.ne.s32.totalorder %s3099_s18, 0  ;;  %s1484_s22 = scalar_lea.sflag [#allocation7], %s1483_s3 }
 0x439   : > { %p2213_p7 = pnand %p2221_p8, %p3100_p0 }
 0x43b   : > { %2508 = dma.done.wait (!%p2213_p7), %s1484_s22, 2048  }
 0x43c   : > { %2510 = vsyncadd (!%p2213_p7), %s1484_s22, 4294965248  ;;  %s21_s4 = sadd.s32 1, %s3097_s13   ;;  %s3102_s5 = sld [smem:[#allocation19_spill]] }
 0x43d   : > { %p3002_p9 = scmp.ge.s32.totalorder %s21_s4, 29   ;;  %s3103_s6 = sld [smem:[#allocation20_spill]] }
 0x43e   : > { %s3104_s15 = smov %s2517_s16  ;;  %s3105_s16 = smov %s2521_s17 }
 0x43f   : > { %s3106_s17 = smov %s2803_s28  ;;  %s3107_s18 = smov %s2529_s19 }
 0x440   : > { %s3108_s19 = smov %s2533_s20  ;;  %s3109_s20 = smov %s2798_s27 }
 0x441   : > { %s3110_s21 = smov %s2549_s24  ;;  %s3111_s22 = smov %s2553_s25 }
 0x442   : > { %s3112_s23 = smov %s2557_s26  ;;  %s3113_s24 = smov %s3102_s5 }
 0x443   : > { %s3114_s25 = smov %s3103_s6  ;;  %s3115_s26 = smov %s3126_s30 }
 0x444   : > { %s3116_s27 = smov %s21_s4  ;;  %20 = sbr.rel (!%p3002_p9) target bundleno = 16 (0x10), region = 122 }
 0x44b   :  { %1489 = vsyncpa [#allocation6], 1 }
 0x44c   :  { %1491 = vsyncpa [#allocation6 + $0x1], 1 }
 0x44d   :  { %1492 = vsyncpa [#allocation9], 1 }
 0x44e   :  { %1493 = vsyncpa [#allocation7], 1 }
 0x44f   :  { %1495 = vsyncpa [#allocation7 + $0x1], 1 }

</bundles_post_ra>
